<compile_context>
chip_gen: v7x
topology: tpu7x:2x2x1
jax: 0.10.0
libtpu: 0.0.40
codegen_flags: <defaults>
</compile_context>

<pallas_src>
import functools

import jax
import jax.numpy as jnp
from jax.experimental import pallas as pl
from jax.experimental.pallas import tpu as pltpu


def _round_up(x: int, m: int) -> int:
    return ((x + m - 1) // m) * m


def _embedding_input_kernel(op_ref, feat_ref, fused_tab_ref, w_feat_ref,
                            b_ref, gamma_ref, beta_ref, o_ref,
                            *, num_embeddings: int, eps: float):
    tn = op_ref.shape[0]
    compute_dtype = fused_tab_ref.dtype

    # ---- Embedding lookup + embedding-half of the Linear: one MXU matmul ----
    # onehot(op) @ (emb_tab @ W_emb)  -> (TN, out_ch), K = num_embeddings.
    op = op_ref[...]                                              # (TN, 1) int32
    lane_ids = jax.lax.broadcasted_iota(jnp.int32, (tn, num_embeddings), 1)
    onehot = (lane_ids == op).astype(compute_dtype)               # (TN, num_emb)
    y = jnp.dot(onehot, fused_tab_ref[...],
                preferred_element_type=jnp.float32)               # (TN, out_ch)

    # ---- Feature half of the Linear (concat is fused by weight split) ----
    y = y + jnp.dot(feat_ref[...], w_feat_ref[...],
                    preferred_element_type=jnp.float32)
    y = y + b_ref[...]                                            # (TN, out_ch)

    # ---- SiLU (EUP sigmoid + VPU mul) ----
    y = y * jax.nn.sigmoid(y)

    # ---- LayerNorm over the channel (lane) dim ----
    mean = jnp.mean(y, axis=-1, keepdims=True)
    centered = y - mean
    var = jnp.mean(centered * centered, axis=-1, keepdims=True)
    y = centered * jax.lax.rsqrt(var + eps)
    y = y * gamma_ref[...] + beta_ref[...]

    o_ref[...] = y.astype(o_ref.dtype)


def embedding_input_layer(op_code, features, params, *, block_rows=512,
                          eps=1e-5, compute_dtype=jnp.bfloat16):
    """op_code: (N, 1) int; features: (N, in_channels) f32 -> (N, out_channels) f32."""
    emb_tab = params["emb"]          # (num_embeddings, emb_size)
    w = params["w"]                  # (emb_size + in_channels, out_channels)
    b = params["b"]                  # (out_channels,)
    gamma = params["gamma"]          # (out_channels,)
    beta = params["beta"]            # (out_channels,)

    n = op_code.shape[0]
    num_embeddings, emb_size = emb_tab.shape
    in_channels = features.shape[-1]
    out_channels = w.shape[-1]

    # Fuse the embedding table into the embedding slice of the linear weight:
    #   concat([E[op], feat]) @ W == onehot(op) @ (E @ W_emb) + feat @ W_feat
    fused_tab = (emb_tab.astype(jnp.float32)
                 @ w[:emb_size].astype(jnp.float32)).astype(compute_dtype)
    w_feat = w[emb_size:].astype(compute_dtype)       # (in_channels, out_ch)
    b2 = b.reshape(1, out_channels).astype(jnp.float32)
    gamma2 = gamma.reshape(1, out_channels).astype(jnp.float32)
    beta2 = beta.reshape(1, out_channels).astype(jnp.float32)

    # Row tiling: large tiles amortize per-grid-step overhead; pad N up so the
    # grid divides evenly, slice the padding back off at the end.
    block_rows = max(8, min(int(block_rows), _round_up(n, 8)))
    n_pad = _round_up(n, block_rows)

    op_i32 = op_code.astype(jnp.int32)
    feat_c = features.astype(compute_dtype)
    if n_pad != n:
        op_i32 = jnp.pad(op_i32, ((0, n_pad - n), (0, 0)))
        feat_c = jnp.pad(feat_c, ((0, n_pad - n), (0, 0)))

    kernel = functools.partial(_embedding_input_kernel,
                               num_embeddings=num_embeddings, eps=eps)

    itemsize = jnp.dtype(compute_dtype).itemsize
    # Advisory cost estimate for XLA's surrounding-op scheduling.
    cost = pl.CostEstimate(
        flops=2 * n_pad * (num_embeddings + in_channels) * out_channels
              + 8 * n_pad * out_channels,
        transcendentals=n_pad * out_channels + 2 * n_pad,
        bytes_accessed=(n_pad * 4                               # op_code
                        + n_pad * in_channels * itemsize        # features
                        + num_embeddings * out_channels * itemsize
                        + in_channels * out_channels * itemsize
                        + 3 * out_channels * 4
                        + n_pad * out_channels * 4),            # output
    )

    # Rough VMEM footprint (double-buffered tiles + resident weights) with
    # headroom, clamped so it never exceeds v7x's 64 MiB physical VMEM.
    resident = (num_embeddings * out_channels + in_channels * out_channels) \
        * itemsize + 3 * out_channels * 4
    per_step = block_rows * (4 + in_channels * itemsize + out_channels * 4)
    vmem_limit = int(min(64 * 1024 * 1024,
                         max(32 * 1024 * 1024, 3 * (resident + 2 * per_step))))

    grid = (n_pad // block_rows,)
    out = pl.pallas_call(
        kernel,
        out_shape=jax.ShapeDtypeStruct((n_pad, out_channels), jnp.float32),
        grid_spec=pltpu.PrefetchScalarGridSpec(
            num_scalar_prefetch=0,
            grid=grid,
            in_specs=[
                pl.BlockSpec((block_rows, 1), lambda i: (i, 0)),
                pl.BlockSpec((block_rows, in_channels), lambda i: (i, 0)),
                pl.BlockSpec((num_embeddings, out_channels), lambda i: (0, 0)),
                pl.BlockSpec((in_channels, out_channels), lambda i: (0, 0)),
                pl.BlockSpec((1, out_channels), lambda i: (0, 0)),
                pl.BlockSpec((1, out_channels), lambda i: (0, 0)),
                pl.BlockSpec((1, out_channels), lambda i: (0, 0)),
            ],
            out_specs=pl.BlockSpec((block_rows, out_channels),
                                   lambda i: (i, 0)),
        ),
        compiler_params=pltpu.CompilerParams(
            dimension_semantics=("parallel",),
            vmem_limit_bytes=vmem_limit),
        cost_estimate=cost,
    )(op_i32, feat_c, fused_tab, w_feat, b2, gamma2, beta2)

    # TODO(synk): for a store-slot-bound profile, emit bf16 output or pad
    # out_channels to 128 lanes (keeping LN stats over the true channels).
    if n_pad != n:
        out = out[:n]
    return out


def init_params(key, in_channels, out_channels, emb_size, num_embeddings):
    full_dim = in_channels + emb_size
    k1, k2, k3 = jax.random.split(key, 3)
    # nn.Embedding default: N(0, 1); nn.Linear: uniform(-1/sqrt(fan_in), ...)
    emb = jax.random.normal(k1, (num_embeddings, emb_size), jnp.float32)
    lim = 1.0 / (full_dim ** 0.5)
    w = jax.random.uniform(k2, (full_dim, out_channels), jnp.float32, -lim, lim)
    b = jax.random.uniform(k3, (out_channels,), jnp.float32, -lim, lim)
    gamma = jnp.ones((out_channels,), jnp.float32)
    beta = jnp.zeros((out_channels,), jnp.float32)
    return {"emb": emb, "w": w, "b": b, "gamma": gamma, "beta": beta}


def reference(op_code, features, params, eps=1e-5):
    """Pure-JAX reference matching the PyTorch module."""
    op = jnp.squeeze(op_code, axis=-1).astype(jnp.int32)
    emb = jnp.take(params["emb"], op, axis=0)
    x = jnp.concatenate([emb, features], axis=-1)
    y = x @ params["w"] + params["b"]
    y = y * jax.nn.sigmoid(y)
    mean = jnp.mean(y, axis=-1, keepdims=True)
    var = jnp.mean((y - mean) ** 2, axis=-1, keepdims=True)
    y = (y - mean) * jax.lax.rsqrt(var + eps)
    return y * params["gamma"] + params["beta"]


if __name__ == "__main__":
    # Small shapes consistent with the module defaults.
    N = 256
    in_channels = 16
    out_channels = 64
    emb_size = 32
    num_embeddings = 128

    key = jax.random.PRNGKey(0)
    kp, ko, kf = jax.random.split(key, 3)
    params = init_params(kp, in_channels, out_channels, emb_size,
                         num_embeddings)

    op_code = jax.random.randint(ko, (N, 1), 0, num_embeddings, jnp.int32)
    features = jax.random.normal(kf, (N, in_channels), jnp.float32)

    ref = reference(op_code, features, params)

    # f32 compute path: tight tolerance against the reference.
    out_f32 = embedding_input_layer(op_code, features, params,
                                    compute_dtype=jnp.float32)
    out_f32 = jax.block_until_ready(out_f32)
    assert out_f32.shape == (N, out_channels)
    assert jnp.allclose(out_f32, ref, atol=1e-4, rtol=1e-4), \
        f"f32 max abs err {jnp.max(jnp.abs(out_f32 - ref))}"

    # bf16 MXU path (default / fast): LayerNorm renormalizes scale, so bf16
    # matmul inputs only introduce ~1e-2-level relative error.
    out_bf16 = embedding_input_layer(op_code, features, params)
    out_bf16 = jax.block_until_ready(out_bf16)
    assert out_bf16.shape == (N, out_channels)
    assert jnp.allclose(out_bf16, ref, atol=5e-2, rtol=5e-2), \
        f"bf16 max abs err {jnp.max(jnp.abs(out_bf16 - ref))}"

    print("KERNEL_OK")
</pallas_src>

<mosaic_0001>
module attributes {stable_mosaic.version = 11 : i64} {
  func.func @_embedding_input_kernel(%arg0: i32, %arg1: memref<256x1xi32, #tpu.memory_space<vmem>>, %arg2: memref<256x16xf32, #tpu.memory_space<vmem>>, %arg3: memref<128x64xf32, #tpu.memory_space<vmem>>, %arg4: memref<16x64xf32, #tpu.memory_space<vmem>>, %arg5: memref<1x64xf32, #tpu.memory_space<vmem>>, %arg6: memref<1x64xf32, #tpu.memory_space<vmem>>, %arg7: memref<1x64xf32, #tpu.memory_space<vmem>>, %arg8: memref<256x64xf32, #tpu.memory_space<vmem>>) attributes {dimension_semantics = [#tpu.dimension_semantics<parallel>], iteration_bounds = array<i64: 1>, scalar_prefetch = 0 : i64, scratch_operands = 0 : i64, tpu.core_type = #tpu.core_type<tc>, window_params = [{transform_indices = @transform_0, window_bounds = array<i64: 256, 1>}, {transform_indices = @transform_1, window_bounds = array<i64: 256, 16>}, {pipeline_mode = #tpu.pipeline_mode<synchronous>, transform_indices = @transform_2, window_bounds = array<i64: 128, 64>}, {pipeline_mode = #tpu.pipeline_mode<synchronous>, transform_indices = @transform_3, window_bounds = array<i64: 16, 64>}, {pipeline_mode = #tpu.pipeline_mode<synchronous>, transform_indices = @transform_4, window_bounds = array<i64: 1, 64>}, {pipeline_mode = #tpu.pipeline_mode<synchronous>, transform_indices = @transform_5, window_bounds = array<i64: 1, 64>}, {pipeline_mode = #tpu.pipeline_mode<synchronous>, transform_indices = @transform_6, window_bounds = array<i64: 1, 64>}, {transform_indices = @transform_7, window_bounds = array<i64: 256, 64>}]} {
    %c0 = arith.constant 0 : index
    %c0_0 = arith.constant 0 : index
    %0 = vector.load %arg1[%c0, %c0_0] : memref<256x1xi32, #tpu.memory_space<vmem>>, vector<256x1xi32>
    %1 = tpu.iota {dimensions = array<i32: 1>} : vector<256x128xi32>
    %2 = vector.broadcast %0 : vector<256x1xi32> to vector<256x128xi32>
    %3 = arith.cmpi eq, %1, %2 : vector<256x128xi32>
    %4 = arith.extui %3 : vector<256x128xi1> to vector<256x128xi32>
    %5 = arith.sitofp %4 : vector<256x128xi32> to vector<256x128xf32>
    %c0_1 = arith.constant 0 : index
    %c0_2 = arith.constant 0 : index
    %6 = vector.load %arg3[%c0_1, %c0_2] : memref<128x64xf32, #tpu.memory_space<vmem>>, vector<128x64xf32>
    %cst = arith.constant dense<0.000000e+00> : vector<256x64xf32>
    %7 = tpu.matmul %5, %6, %cst {dimension_numbers = #tpu.dot_dimension_numbers<[1], [0], [0], [1], [0, 0, 1, 1], [], []>} : vector<256x128xf32>, vector<128x64xf32>, vector<256x64xf32> -> vector<256x64xf32>
    %c0_3 = arith.constant 0 : index
    %c0_4 = arith.constant 0 : index
    %8 = vector.load %arg2[%c0_3, %c0_4] : memref<256x16xf32, #tpu.memory_space<vmem>>, vector<256x16xf32>
    %c0_5 = arith.constant 0 : index
    %c0_6 = arith.constant 0 : index
    %9 = vector.load %arg4[%c0_5, %c0_6] : memref<16x64xf32, #tpu.memory_space<vmem>>, vector<16x64xf32>
    %cst_7 = arith.constant dense<0.000000e+00> : vector<256x64xf32>
    %10 = tpu.matmul %8, %9, %cst_7 {dimension_numbers = #tpu.dot_dimension_numbers<[1], [0], [0], [1], [0, 0, 1, 1], [], []>} : vector<256x16xf32>, vector<16x64xf32>, vector<256x64xf32> -> vector<256x64xf32>
    %11 = arith.addf %7, %10 : vector<256x64xf32>
    %c0_8 = arith.constant 0 : index
    %c0_9 = arith.constant 0 : index
    %12 = vector.load %arg5[%c0_8, %c0_9] : memref<1x64xf32, #tpu.memory_space<vmem>>, vector<1x64xf32>
    %13 = vector.broadcast %12 : vector<1x64xf32> to vector<256x64xf32>
    %14 = arith.addf %11, %13 : vector<256x64xf32>
    %15 = arith.negf %14 : vector<256x64xf32>
    %16 = math.exp %15 : vector<256x64xf32>
    %cst_10 = arith.constant 1.000000e+00 : f32
    %17 = vector.broadcast %cst_10 : f32 to vector<256x64xf32>
    %18 = arith.addf %17, %16 : vector<256x64xf32>
    %19 = arith.divf %17, %18 : vector<256x64xf32>
    %20 = arith.mulf %14, %19 : vector<256x64xf32>
    %cst_11 = arith.constant dense<0.000000e+00> : vector<256xf32>
    %21 = vector.multi_reduction <add>, %20, %cst_11 [1] : vector<256x64xf32> to vector<256xf32>
    %22 = vector.shape_cast %21 : vector<256xf32> to vector<256x1xf32>
    %cst_12 = arith.constant 6.400000e+01 : f32
    %23 = vector.broadcast %cst_12 : f32 to vector<256x1xf32>
    %24 = arith.divf %22, %23 : vector<256x1xf32>
    %25 = vector.broadcast %24 : vector<256x1xf32> to vector<256x64xf32>
    %26 = arith.subf %20, %25 : vector<256x64xf32>
    %27 = arith.mulf %26, %26 : vector<256x64xf32>
    %cst_13 = arith.constant dense<0.000000e+00> : vector<256xf32>
    %28 = vector.multi_reduction <add>, %27, %cst_13 [1] : vector<256x64xf32> to vector<256xf32>
    %29 = vector.shape_cast %28 : vector<256xf32> to vector<256x1xf32>
    %cst_14 = arith.constant 6.400000e+01 : f32
    %30 = vector.broadcast %cst_14 : f32 to vector<256x1xf32>
    %31 = arith.divf %29, %30 : vector<256x1xf32>
    %cst_15 = arith.constant 9.99999974E-6 : f32
    %32 = vector.broadcast %cst_15 : f32 to vector<256x1xf32>
    %33 = arith.addf %31, %32 : vector<256x1xf32>
    %34 = math.rsqrt %33 : vector<256x1xf32>
    %35 = vector.broadcast %34 : vector<256x1xf32> to vector<256x64xf32>
    %36 = arith.mulf %26, %35 : vector<256x64xf32>
    %c0_16 = arith.constant 0 : index
    %c0_17 = arith.constant 0 : index
    %37 = vector.load %arg6[%c0_16, %c0_17] : memref<1x64xf32, #tpu.memory_space<vmem>>, vector<1x64xf32>
    %38 = vector.broadcast %37 : vector<1x64xf32> to vector<256x64xf32>
    %39 = arith.mulf %36, %38 : vector<256x64xf32>
    %c0_18 = arith.constant 0 : index
    %c0_19 = arith.constant 0 : index
    %40 = vector.load %arg7[%c0_18, %c0_19] : memref<1x64xf32, #tpu.memory_space<vmem>>, vector<1x64xf32>
    %41 = vector.broadcast %40 : vector<1x64xf32> to vector<256x64xf32>
    %42 = arith.addf %39, %41 : vector<256x64xf32>
    %c0_20 = arith.constant 0 : index
    %c0_21 = arith.constant 0 : index
    %43 = vector.load %arg8[%c0_20, %c0_21] : memref<256x64xf32, #tpu.memory_space<vmem>>, vector<256x64xf32>
    tpu.vector_store %arg8[%c0_20, %c0_21], %42 {strides = array<i32>} : memref<256x64xf32, #tpu.memory_space<vmem>>, vector<256x64xf32>,
    return
  }
  func.func @transform_0(%arg0: i32) -> (i32, i32) {
    %c0_i32 = arith.constant 0 : i32
    %c0_i32_0 = arith.constant 0 : i32
    return %arg0, %c0_i32 : i32, i32
  }
  func.func @transform_1(%arg0: i32) -> (i32, i32) {
    %c0_i32 = arith.constant 0 : i32
    %c0_i32_0 = arith.constant 0 : i32
    return %arg0, %c0_i32 : i32, i32
  }
  func.func @transform_2(%arg0: i32) -> (i32, i32) {
    %c0_i32 = arith.constant 0 : i32
    %c0_i32_0 = arith.constant 0 : i32
    %c0_i32_1 = arith.constant 0 : i32
    return %c0_i32, %c0_i32_0 : i32, i32
  }
  func.func @transform_3(%arg0: i32) -> (i32, i32) {
    %c0_i32 = arith.constant 0 : i32
    %c0_i32_0 = arith.constant 0 : i32
    %c0_i32_1 = arith.constant 0 : i32
    return %c0_i32, %c0_i32_0 : i32, i32
  }
  func.func @transform_4(%arg0: i32) -> (i32, i32) {
    %c0_i32 = arith.constant 0 : i32
    %c0_i32_0 = arith.constant 0 : i32
    %c0_i32_1 = arith.constant 0 : i32
    return %c0_i32, %c0_i32_0 : i32, i32
  }
  func.func @transform_5(%arg0: i32) -> (i32, i32) {
    %c0_i32 = arith.constant 0 : i32
    %c0_i32_0 = arith.constant 0 : i32
    %c0_i32_1 = arith.constant 0 : i32
    return %c0_i32, %c0_i32_0 : i32, i32
  }
  func.func @transform_6(%arg0: i32) -> (i32, i32) {
    %c0_i32 = arith.constant 0 : i32
    %c0_i32_0 = arith.constant 0 : i32
    %c0_i32_1 = arith.constant 0 : i32
    return %c0_i32, %c0_i32_0 : i32, i32
  }
  func.func @transform_7(%arg0: i32) -> (i32, i32) {
    %c0_i32 = arith.constant 0 : i32
    %c0_i32_0 = arith.constant 0 : i32
    return %arg0, %c0_i32 : i32, i32
  }
}

</mosaic_0001>

<bundles_post_ra>
// kernel: tpu_custom_call.1
= control target key start
LH: loop header
LB: loop body
LE: loop exit
PB: predicated region body
PF: predicated region fallthrough
CT: control target
= control target key end

     0   :  { %v2269_v0 = vmov 0   ;;  %vm302_vm0 = vcmask 130048   ;;  %s3434_s0 = inlined_call_operand.vmem [shape: s32[256,1], index: 0, kind: input, shape index: {}]   ;;  %s3435_s3 = inlined_call_operand.vmem [shape: f32[16,64], index: 3, kind: input, shape index: {}]   ;;  %s3436_s1 = inlined_call_operand.vmem [shape: f32[256,16], index: 1, kind: input, shape index: {}]   ;;  %s3437_s2 = inlined_call_operand.vmem [shape: f32[128,64], index: 2, kind: input, shape index: {}]   ;;  %s3438_s4 = inlined_call_operand.vmem [shape: f32[1,64], index: 4, kind: input, shape index: {}]   ;;  %s3439_s5 = inlined_call_operand.vmem [shape: f32[1,64], index: 5, kind: input, shape index: {}]   ;;  %s3440_s6 = inlined_call_operand.vmem [shape: f32[1,64], index: 6, kind: input, shape index: {}]   ;;  %s3441_s7 = inlined_call_operand.vmem [shape: f32[256,64], index: 7, kind: output, shape index: {}]  }
   0x1   :  { %2076 = vset.pattern.permute.xlu1 %v2269_v0  ;;  %2075 = vset.pattern.permute.xlu0 %v2269_v0  ;;  %v36_v1 = vld [vmem:[%s3434_s0 + $0x50] sm:$0xff]  ;;  %v34_v2 = vld [vmem:[%s3434_s0 + $0x40] sm:$0xff]  ;;  %v37_v3 = vld [vmem:[%s3434_s0 + $0x58] sm:$0xff] }
   0x2   :  { %91 = vperm.xlu1 %2076, %v36_v1   ;;  %85 = vperm.xlu0 %2075, %v34_v2   ;;  %v35_v4 = vld [vmem:[%s3434_s0 + $0x48] sm:$0xff]  ;;  %v38_v6 = vld [vmem:[%s3434_s0 + $0x60] sm:$0xff]  ;;  %v41_v7 = vld [vmem:[%s3434_s0 + $0x78] sm:$0xff] }
   0x3   :  { %v39_v5 = vld [vmem:[%s3434_s0 + $0x68] sm:$0xff]  ;;  %v40_v8 = vld [vmem:[%s3434_s0 + $0x70] sm:$0xff]  ;;  %v300_v9 = vld [vmem:[%s3435_s3] sm:$0xff] }
   0x4   :  { %v301_v10 = vld [vmem:[%s3435_s3 + $0x8] sm:$0xff]  ;;  %v268_v11 = vld [vmem:[%s3436_s1] sm:$0xff]  ;;  %v254_v16 = vld [vmem:[%s3437_s2 + $0x10] sm:$0xff] }
   0x5   :  { %v1989_v12 = vpack.c.bf16 %v301_v10, %v300_v9  ;;  %1861 = vmatprep.mubr.msk.f32.mxu0 %vm302_vm0, %v268_v11  ;;  %v252_v13 = vld [vmem:[%s3437_s2] sm:$0xff]  ;;  %v253_v14 = vld [vmem:[%s3437_s2 + $0x8] sm:$0xff]  ;;  %v255_v17 = vld [vmem:[%s3437_s2 + $0x18] sm:$0xff] }
   0x6   :  { %94 = vperm.xlu1 %2076, %v37_v3   ;;  %88 = vperm.xlu0 %2075, %v35_v4   ;;  %v1993_v15 = vpack.c.bf16 %v253_v14, %v252_v13  ;;  %v43_v18 = vld [vmem:[%s3434_s0 + $0x88] sm:$0xff]  ;;  %v42_v19 = vld [vmem:[%s3434_s0 + $0x80] sm:$0xff]  ;;  %v1997_v20 = vpack.c.bf16 %v255_v17, %v254_v16  ;;  %v270_v24 = vld [vmem:[%s3436_s1 + $0x10] sm:$0xff] }
   0x7   :  { %1990 = vmatprep.subr.bf16.mxu0 %v1989_v12  ;;  %v269_v21 = vld [vmem:[%s3436_s1 + $0x8] sm:$0xff]  ;;  %v256_v22 = vld [vmem:[%s3437_s2 + $0x20] sm:$0xff]  ;;  %v45_v25 = vld [vmem:[%s3434_s0 + $0x98] sm:$0xff] }
   0x8   :  { %1992 = vmatpush3.bf16.msra.mxu0 %v1989_v12  ;;  %2025 = vmatprep.subr.bf16.mxu1 %v1993_v15  ;;  %v257_v23 = vld [vmem:[%s3437_s2 + $0x28] sm:$0xff]  ;;  %v44_v26 = vld [vmem:[%s3434_s0 + $0x90] sm:$0xff]  ;;  %v271_v28 = vld [vmem:[%s3436_s1 + $0x18] sm:$0xff] }
   0x9   :  { %1994 = vmatprep.subr.bf16.mxu0 %v1993_v15  ;;  %2033 = vmatpush3.bf16.msra.mxu1 %v1993_v15  ;;  %v2001_v27 = vpack.c.bf16 %v257_v23, %v256_v22  ;;  %v258_v29 = vld [vmem:[%s3437_s2 + $0x30] sm:$0xff]  ;;  %v259_v30 = vld [vmem:[%s3437_s2 + $0x38] sm:$0xff]  ;;  %v272_v31 = vld [vmem:[%s3436_s1 + $0x20] sm:$0xff] }
   0xa   :  { %100 = vperm.xlu1 %2076, %v39_v5   ;;  %97 = vperm.xlu0 %2075, %v38_v6   ;;  %v47_v32 = vld [vmem:[%s3434_s0 + $0xa8] sm:$0xff]  ;;  %v46_v33 = vld [vmem:[%s3434_s0 + $0xa0] sm:$0xff]  ;;  %v2005_v34 = vpack.c.bf16 %v259_v30, %v258_v29  ;;  %v274_v38 = vld [vmem:[%s3436_s1 + $0x30] sm:$0xff] }
   0xb   :  { %1862 = vmatmul.mubr.msk.f32.vlgmr.msra.gmra.mrb[0].mxu0 %vm302_vm0, %v269_v21  ;;  %2026 = vmatprep.subr.bf16.mxu1 %v1997_v20  ;;  %v273_v35 = vld [vmem:[%s3436_s1 + $0x28] sm:$0xff]  ;;  %v260_v36 = vld [vmem:[%s3437_s2 + $0x40] sm:$0xff]  ;;  %v49_v39 = vld [vmem:[%s3434_s0 + $0xb8] sm:$0xff] }
   0xc   :  { %1996 = vmatpush3.bf16.msra.mxu0 %v1993_v15  ;;  %1864 = vmatprep.mubr.msk.f32.mxu0 %vm302_vm0, %v270_v24  ;;  %v261_v37 = vld [vmem:[%s3437_s2 + $0x48] sm:$0xff]  ;;  %v48_v40 = vld [vmem:[%s3434_s0 + $0xb0] sm:$0xff]  ;;  %v275_v42 = vld [vmem:[%s3436_s1 + $0x38] sm:$0xff] }
   0xd   :  { %2034 = vmatpush3.bf16.msra.mxu1 %v1997_v20  ;;  %1998 = vmatprep.subr.bf16.mxu0 %v1997_v20  ;;  %v2009_v41 = vpack.c.bf16 %v261_v37, %v260_v36  ;;  %v262_v43 = vld [vmem:[%s3437_s2 + $0x50] sm:$0xff]  ;;  %v263_v44 = vld [vmem:[%s3437_s2 + $0x58] sm:$0xff]  ;;  %v276_v45 = vld [vmem:[%s3436_s1 + $0x40] sm:$0xff] }
   0xe   :  { %106 = vperm.xlu1 %2076, %v41_v7   ;;  %103 = vperm.xlu0 %2075, %v40_v8   ;;  %v51_v46 = vld [vmem:[%s3434_s0 + $0xc8] sm:$0xff]  ;;  %v50_v47 = vld [vmem:[%s3434_s0 + $0xc0] sm:$0xff]  ;;  %v2013_v48 = vpack.c.bf16 %v263_v44, %v262_v43  ;;  %v278_v52 = vld [vmem:[%s3436_s1 + $0x50] sm:$0xff] }
   0xf   :  { %1865 = vmatmul.mubr.msk.f32.gmra.mrb[2].mxu0 %vm302_vm0, %v271_v28  ;;  %2027 = vmatprep.subr.bf16.mxu1 %v2001_v27  ;;  %v277_v49 = vld [vmem:[%s3436_s1 + $0x48] sm:$0xff]  ;;  %v264_v50 = vld [vmem:[%s3437_s2 + $0x60] sm:$0xff]  ;;  %v279_v56 = vld [vmem:[%s3436_s1 + $0x58] sm:$0xff]  ;;  %v58_v28 = vlaneseq }
  0x10   :  { %1867 = vmatprep.mubr.msk.f32.mxu0 %vm302_vm0, %v272_v31  ;;  %2000 = vmatpush3.bf16.msra.mxu0 %v1997_v20  ;;  %v265_v51 = vld [vmem:[%s3437_s2 + $0x68] sm:$0xff]  ;;  %v26_v54 = vld [vmem:[%s3434_s0] sm:$0xff]  ;;  %v266_v57 = vld [vmem:[%s3437_s2 + $0x70] sm:$0xff] }
  0x11   :  { %2035 = vmatpush3.bf16.msra.mxu1 %v2001_v27  ;;  %2002 = vmatprep.subr.bf16.mxu0 %v2001_v27  ;;  %v27_v53 = vld [vmem:[%s3434_s0 + $0x8] sm:$0xff]  ;;  %v2017_v55 = vpack.c.bf16 %v265_v51, %v264_v50  ;;  %v267_v58 = vld [vmem:[%s3437_s2 + $0x78] sm:$0xff]  ;;  %v280_v59 = vld [vmem:[%s3436_s1 + $0x60] sm:$0xff]  ;;  %v2589_v29 = vand.u32 127, %v58_v28 }
  0x12   :  { %112 = vperm.xlu1 %2076, %v43_v18   ;;  %109 = vperm.xlu0 %2075, %v42_v19   ;;  %v53_v60 = vld [vmem:[%s3434_s0 + $0xd8] sm:$0xff]  ;;  %v52_v61 = vld [vmem:[%s3434_s0 + $0xd0] sm:$0xff]  ;;  %v2021_v62 = vpack.c.bf16 %v267_v58, %v266_v57  ;;  %v281_v63 = vld [vmem:[%s3436_s1 + $0x68] sm:$0xff] }
  0x13   :  { %1868 = vmatmul.mubr.msk.f32.gmra.mrb[4].mxu0 %vm302_vm0, %v273_v35  ;;  %2028 = vmatprep.subr.bf16.mxu1 %v2005_v34  ;;  %v282_v0 = vld [vmem:[%s3436_s1 + $0x70] sm:$0xff]  ;;  %v29_v1 = vld [vmem:[%s3434_s0 + $0x18] sm:$0xff]  ;;  %v284_v4 = vld [vmem:[%s3436_s1 + $0x80] sm:$0xff] }
  0x14   :  { %1870 = vmatprep.mubr.msk.f32.mxu0 %vm302_vm0, %v274_v38  ;;  %2004 = vmatpush3.bf16.msra.mxu0 %v2001_v27  ;;  %v28_v2 = vld [vmem:[%s3434_s0 + $0x10] sm:$0xff]  ;;  %v283_v3 = vld [vmem:[%s3436_s1 + $0x78] sm:$0xff]  ;;  %v55_v5 = vld [vmem:[%s3434_s0 + $0xe8] sm:$0xff] }
  0x15   :  { %2036 = vmatpush3.bf16.msra.mxu1 %v2005_v34  ;;  %2006 = vmatprep.subr.bf16.mxu0 %v2005_v34  ;;  %v54_v6 = vld [vmem:[%s3434_s0 + $0xe0] sm:$0xff]  ;;  %v285_v7 = vld [vmem:[%s3436_s1 + $0x88] sm:$0xff]  ;;  %v286_v8 = vld [vmem:[%s3436_s1 + $0x90] sm:$0xff] }
  0x16   :  { %118 = vperm.xlu1 %2076, %v45_v25   ;;  %115 = vperm.xlu0 %2075, %v44_v26   ;;  %v31_v9 = vld [vmem:[%s3434_s0 + $0x28] sm:$0xff]  ;;  %v30_v10 = vld [vmem:[%s3434_s0 + $0x20] sm:$0xff]  ;;  %v287_v11 = vld [vmem:[%s3436_s1 + $0x98] sm:$0xff] }
  0x17   :  { %1871 = vmatmul.mubr.msk.f32.gmra.mrb[6].mxu0 %vm302_vm0, %v275_v42  ;;  %2029 = vmatprep.subr.bf16.mxu1 %v2009_v41  ;;  %v288_v12 = vld [vmem:[%s3436_s1 + $0xa0] sm:$0xff]  ;;  %v57_v13 = vld [vmem:[%s3434_s0 + $0xf8] sm:$0xff]  ;;  %v56_v14 = vld [vmem:[%s3434_s0 + $0xf0] sm:$0xff] }
  0x18   :  { %1873 = vmatprep.mubr.msk.f32.mxu0 %vm302_vm0, %v276_v45  ;;  %2008 = vmatpush3.bf16.msra.mxu0 %v2005_v34  ;;  %v289_v15 = vld [vmem:[%s3436_s1 + $0xa8] sm:$0xff]  ;;  %v290_v16 = vld [vmem:[%s3436_s1 + $0xb0] sm:$0xff]  ;;  %v33_v17 = vld [vmem:[%s3434_s0 + $0x38] sm:$0xff] }
  0x19   :  { %2037 = vmatpush3.bf16.msra.mxu1 %v2009_v41  ;;  %2010 = vmatprep.subr.bf16.mxu0 %v2009_v41  ;;  %v32_v18 = vld [vmem:[%s3434_s0 + $0x30] sm:$0xff]  ;;  %v291_v19 = vld [vmem:[%s3436_s1 + $0xb8] sm:$0xff]  ;;  %v292_v20 = vld [vmem:[%s3436_s1 + $0xc0] sm:$0xff] }
  0x1a   :  { %124 = vperm.xlu1 %2076, %v47_v32   ;;  %121 = vperm.xlu0 %2075, %v46_v33   ;;  %v293_v21 = vld [vmem:[%s3436_s1 + $0xc8] sm:$0xff]  ;;  %v294_v22 = vld [vmem:[%s3436_s1 + $0xd0] sm:$0xff]  ;;  %v295_v23 = vld [vmem:[%s3436_s1 + $0xd8] sm:$0xff]  ;;  %v2270_v32 = vmov 1.0  }
  0x1b   :  { %1874 = vmatmul.mubr.msk.f32.gmra.mrb[8].mxu0 %vm302_vm0, %v277_v49  ;;  %2030 = vmatprep.subr.bf16.mxu1 %v2013_v48  ;;  %v296_v24 = vld [vmem:[%s3436_s1 + $0xe0] sm:$0xff]  ;;  %v297_v25 = vld [vmem:[%s3436_s1 + $0xe8] sm:$0xff]  ;;  %v298_v26 = vld [vmem:[%s3436_s1 + $0xf0] sm:$0xff] }
  0x1c   :  { %1876 = vmatprep.mubr.msk.f32.mxu0 %vm302_vm0, %v278_v52  ;;  %2012 = vmatpush3.bf16.msra.mxu0 %v2009_v41  ;;  %v299_v27 = vld [vmem:[%s3436_s1 + $0xf8] sm:$0xff] }
  0x1d   :  { %2038 = vmatpush3.bf16.msra.mxu1 %v2013_v48  ;;  %2014 = vmatprep.subr.bf16.mxu0 %v2013_v48 }
  0x1e   :  { %130 = vperm.xlu1 %2076, %v49_v39   ;;  %127 = vperm.xlu0 %2075, %v48_v40  }
  0x1f   :  { %1877 = vmatmul.mubr.msk.f32.gmra.mrb[10].mxu0 %vm302_vm0, %v279_v56  ;;  %2031 = vmatprep.subr.bf16.mxu1 %v2017_v55 }
  0x20   :  { %1879 = vmatprep.mubr.msk.f32.mxu0 %vm302_vm0, %v280_v59  ;;  %2016 = vmatpush3.bf16.msra.mxu0 %v2013_v48 }
  0x21   :  { %2039 = vmatpush3.bf16.msra.mxu1 %v2017_v55  ;;  %2018 = vmatprep.subr.bf16.mxu0 %v2017_v55 }
  0x22   :  { %136 = vperm.xlu1 %2076, %v51_v46   ;;  %133 = vperm.xlu0 %2075, %v50_v47  }
  0x23   :  { %1880 = vmatmul.mubr.msk.f32.gmra.mrb[12].mxu0 %vm302_vm0, %v281_v63  ;;  %2032 = vmatprep.subr.bf16.mxu1 %v2021_v62 }
  0x24   :  { %1882 = vmatprep.mubr.msk.f32.mxu0 %vm302_vm0, %v282_v0  ;;  %2020 = vmatpush3.bf16.msra.mxu0 %v2017_v55 }
  0x25   :  { %2040 = vmatpush3.bf16.msra.mxu1 %v2021_v62  ;;  %2022 = vmatprep.subr.bf16.mxu0 %v2021_v62 }
  0x26   :  { %64 = vperm.xlu1 %2076, %v27_v53   ;;  %61 = vperm.xlu0 %2075, %v26_v54  }
  0x27   :  { %1883 = vmatmul.mubr.msk.f32.gmra.mrb[14].mxu0 %vm302_vm0, %v283_v3 }
  0x28   :  { %1885 = vmatprep.mubr.msk.f32.mxu0 %vm302_vm0, %v284_v4  ;;  %2024 = vmatpush3.bf16.msra.mxu0 %v2021_v62 }
  0x2a   :  { %142 = vperm.xlu1 %2076, %v53_v60   ;;  %139 = vperm.xlu0 %2075, %v52_v61  }
  0x2b   :  { %1886 = vmatmul.mubr.msk.f32.gmra.mrb[16].mxu0 %vm302_vm0, %v285_v7 }
  0x2c   :  { %1888 = vmatprep.mubr.msk.f32.mxu0 %vm302_vm0, %v286_v8 }
  0x2e   :  { %70 = vperm.xlu1 %2076, %v29_v1   ;;  %67 = vperm.xlu0 %2075, %v28_v2  }
  0x2f   :  { %1889 = vmatmul.mubr.msk.f32.gmra.mrb[18].mxu0 %vm302_vm0, %v287_v11 }
  0x30   :  { %1891 = vmatprep.mubr.msk.f32.mxu0 %vm302_vm0, %v288_v12 }
  0x32   :  { %148 = vperm.xlu1 %2076, %v55_v5   ;;  %145 = vperm.xlu0 %2075, %v54_v6  }
  0x33   :  { %1892 = vmatmul.mubr.msk.f32.gmra.mrb[20].mxu0 %vm302_vm0, %v289_v15 }
  0x34   :  { %1894 = vmatprep.mubr.msk.f32.mxu0 %vm302_vm0, %v290_v16 }
  0x36   :  { %76 = vperm.xlu1 %2076, %v31_v9   ;;  %73 = vperm.xlu0 %2075, %v30_v10  }
  0x37   :  { %1895 = vmatmul.mubr.msk.f32.gmra.mrb[22].mxu0 %vm302_vm0, %v291_v19 }
  0x38   :  { %1897 = vmatprep.mubr.msk.f32.mxu0 %vm302_vm0, %v292_v20 }
  0x3a   :  { %154 = vperm.xlu1 %2076, %v57_v13   ;;  %151 = vperm.xlu0 %2075, %v56_v14  }
  0x3b   :  { %1898 = vmatmul.mubr.msk.f32.gmra.mrb[24].mxu0 %vm302_vm0, %v293_v21 }
  0x3c   :  { %1900 = vmatprep.mubr.msk.f32.mxu0 %vm302_vm0, %v294_v22 }
  0x3e   :  { %82 = vperm.xlu1 %2076, %v33_v17   ;;  %79 = vperm.xlu0 %2075, %v32_v18  }
  0x3f   :  { %1901 = vmatmul.mubr.msk.f32.gmra.mrb[26].mxu0 %vm302_vm0, %v295_v23 }
  0x40   :  { %1903 = vmatprep.mubr.msk.f32.mxu0 %vm302_vm0, %v296_v24 }
  0x43   :  { %1904 = vmatmul.mubr.msk.f32.gmra.mrb[28].mxu0 %vm302_vm0, %v297_v25 }
  0x44   :  { %1906 = vmatprep.mubr.msk.f32.mxu0 %vm302_vm0, %v298_v26 }
  0x47   :  { %1907 = vmatmul.mubr.msk.f32.gmra.mrb[30].mxu0 %vm302_vm0, %v299_v27 }
  0x81   :  { %v92_v30 = vpop.permute.xlu1 %91  ;;  %v86_v31 = vpop.permute.xlu0 %85 }
  0x82   :  { %vm164_vm1 = vcmp.eq.s32.totalorder %v2589_v29, %v86_v31  ;;  %vm166_vm3 = vcmp.eq.s32.totalorder %v2589_v29, %v92_v30 }
  0x83   :  { %1953 = vmatprep.mubr.msk.f32.mxu1 %vm164_vm1, %v2270_v32 }
  0x85   :  { %v95_v33 = vpop.permute.xlu1 %94  ;;  %v89_v34 = vpop.permute.xlu0 %88 }
  0x86   :  { %vm165_vm2 = vcmp.eq.s32.totalorder %v2589_v29, %v89_v34  ;;  %vm167_vm4 = vcmp.eq.s32.totalorder %v2589_v29, %v95_v33 }
  0x87   :  { %1954 = vmatmul.mubr.msk.f32.vlgmr.msra.gmra.mrb[0].mxu1 %vm165_vm2, %v2270_v32 }
  0x88   :  { %1956 = vmatprep.mubr.msk.f32.mxu1 %vm166_vm3, %v2270_v32 }
  0x89   :  { %v101_v35 = vpop.permute.xlu1 %100  ;;  %v98_v36 = vpop.permute.xlu0 %97 }
  0x8a   :  { %vm168_vm5 = vcmp.eq.s32.totalorder %v2589_v29, %v98_v36  ;;  %vm169_vm6 = vcmp.eq.s32.totalorder %v2589_v29, %v101_v35 }
  0x8b   :  { %1957 = vmatmul.mubr.msk.f32.gmra.mrb[2].mxu1 %vm167_vm4, %v2270_v32 }
  0x8c   :  { %1959 = vmatprep.mubr.msk.f32.mxu1 %vm168_vm5, %v2270_v32 }
  0x8d   :  { %v107_v37 = vpop.permute.xlu1 %106  ;;  %v104_v38 = vpop.permute.xlu0 %103 }
  0x8e   :  { %vm170_vm7 = vcmp.eq.s32.totalorder %v2589_v29, %v104_v38  ;;  %vm171_vm8 = vcmp.eq.s32.totalorder %v2589_v29, %v107_v37 }
  0x8f   :  { %1960 = vmatmul.mubr.msk.f32.gmra.mrb[4].mxu1 %vm169_vm6, %v2270_v32 }
  0x90   :  { %1962 = vmatprep.mubr.msk.f32.mxu1 %vm170_vm7, %v2270_v32 }
  0x91   :  { %v113_v39 = vpop.permute.xlu1 %112  ;;  %v110_v40 = vpop.permute.xlu0 %109 }
  0x92   :  { %vm172_vm9 = vcmp.eq.s32.totalorder %v2589_v29, %v110_v40  ;;  %vm173_vm10 = vcmp.eq.s32.totalorder %v2589_v29, %v113_v39 }
  0x93   :  { %1963 = vmatmul.mubr.msk.f32.gmra.mrb[6].mxu1 %vm171_vm8, %v2270_v32 }
  0x94   :  { %1965 = vmatprep.mubr.msk.f32.mxu1 %vm172_vm9, %v2270_v32 }
  0x95   :  { %v119_v41 = vpop.permute.xlu1 %118  ;;  %v116_v42 = vpop.permute.xlu0 %115 }
  0x96   :  { %vm174_vm11 = vcmp.eq.s32.totalorder %v2589_v29, %v116_v42  ;;  %vm175_vm12 = vcmp.eq.s32.totalorder %v2589_v29, %v119_v41 }
  0x97   :  { %1966 = vmatmul.mubr.msk.f32.gmra.mrb[8].mxu1 %vm173_vm10, %v2270_v32 }
  0x98   :  { %1968 = vmatprep.mubr.msk.f32.mxu1 %vm174_vm11, %v2270_v32 }
  0x99   :  { %v125_v43 = vpop.permute.xlu1 %124  ;;  %v122_v44 = vpop.permute.xlu0 %121 }
  0x9a   :  { %vm176_vm13 = vcmp.eq.s32.totalorder %v2589_v29, %v122_v44  ;;  %vm177_vm14 = vcmp.eq.s32.totalorder %v2589_v29, %v125_v43 }
  0x9b   :  { %1969 = vmatmul.mubr.msk.f32.gmra.mrb[10].mxu1 %vm175_vm12, %v2270_v32 }
  0x9c   :  { %1971 = vmatprep.mubr.msk.f32.mxu1 %vm176_vm13, %v2270_v32 }
  0x9d   :  { %v131_v45 = vpop.permute.xlu1 %130  ;;  %v128_v46 = vpop.permute.xlu0 %127 }
  0x9e   :  { %vm178_vm15 = vcmp.eq.s32.totalorder %v2589_v29, %v128_v46  ;;  %vm179_vm0 = vcmp.eq.s32.totalorder %v2589_v29, %v131_v45 }
  0x9f   :  { %1972 = vmatmul.mubr.msk.f32.gmra.mrb[12].mxu1 %vm177_vm14, %v2270_v32 }
  0xa0   :  { %1974 = vmatprep.mubr.msk.f32.mxu1 %vm178_vm15, %v2270_v32 }
  0xa1   :  { %v137_v47 = vpop.permute.xlu1 %136  ;;  %v134_v48 = vpop.permute.xlu0 %133 }
  0xa2   :  { %vm180_vm1 = vcmp.eq.s32.totalorder %v2589_v29, %v134_v48  ;;  %vm181_vm2 = vcmp.eq.s32.totalorder %v2589_v29, %v137_v47 }
  0xa3   :  { %1975 = vmatmul.mubr.msk.f32.gmra.mrb[14].mxu1 %vm179_vm0, %v2270_v32 }
  0xa4   :  { %1977 = vmatprep.mubr.msk.f32.mxu1 %vm180_vm1, %v2270_v32  ;;  %vm1112_vm1 = vcmask 523264  }
  0xa5   :  { %v65_v49 = vpop.permute.xlu1 %64  ;;  %v62_v50 = vpop.permute.xlu0 %61 }
  0xa6   :  { %vm157_vm3 = vcmp.eq.s32.totalorder %v2589_v29, %v65_v49  ;;  %vm156_vm4 = vcmp.eq.s32.totalorder %v2589_v29, %v62_v50  ;;  %v2682_v50 = vld [vmem:[%s3438_s4] ss:$0 sm:$0xff] }
  0xa7   :  { %1941 = vmatprep.mubr.msk.f32.mxu0 %vm156_vm4, %v2270_v32  ;;  %1978 = vmatmul.mubr.msk.f32.gmra.mrb[16].mxu1 %vm181_vm2, %v2270_v32 }
  0xa8   :  { %1942 = vmatmul.mubr.msk.f32.vlgmr.msra.gmra.mrb[0].mxu0 %vm157_vm3, %v2270_v32 }
  0xa9   :  { %v143_v51 = vpop.permute.xlu1 %142  ;;  %v140_v52 = vpop.permute.xlu0 %139 }
  0xaa   :  { %vm183_vm5 = vcmp.eq.s32.totalorder %v2589_v29, %v143_v51  ;;  %vm182_vm6 = vcmp.eq.s32.totalorder %v2589_v29, %v140_v52 }
  0xab   :  { %1980 = vmatprep.mubr.msk.f32.mxu1 %vm182_vm6, %v2270_v32 }
  0xac   :  { %1981 = vmatmul.mubr.msk.f32.gmra.mrb[18].mxu1 %vm183_vm5, %v2270_v32 }
  0xad   :  { %v71_v53 = vpop.permute.xlu1 %70  ;;  %v68_v54 = vpop.permute.xlu0 %67 }
  0xae   :  { %vm159_vm7 = vcmp.eq.s32.totalorder %v2589_v29, %v71_v53  ;;  %vm158_vm8 = vcmp.eq.s32.totalorder %v2589_v29, %v68_v54 }
  0xaf   :  { %1944 = vmatprep.mubr.msk.f32.mxu0 %vm158_vm8, %v2270_v32 }
  0xb0   :  { %1945 = vmatmul.mubr.msk.f32.gmra.mrb[2].mxu0 %vm159_vm7, %v2270_v32 }
  0xb1   :  { %v149_v55 = vpop.permute.xlu1 %148  ;;  %v146_v56 = vpop.permute.xlu0 %145 }
  0xb2   :  { %vm185_vm9 = vcmp.eq.s32.totalorder %v2589_v29, %v149_v55  ;;  %vm184_vm10 = vcmp.eq.s32.totalorder %v2589_v29, %v146_v56 }
  0xb3   :  { %1983 = vmatprep.mubr.msk.f32.mxu1 %vm184_vm10, %v2270_v32 }
  0xb4   :  { %1984 = vmatmul.mubr.msk.f32.gmra.mrb[20].mxu1 %vm185_vm9, %v2270_v32 }
  0xb5   :  { %v77_v57 = vpop.permute.xlu1 %76  ;;  %v74_v58 = vpop.permute.xlu0 %73 }
  0xb6   :  { %vm161_vm11 = vcmp.eq.s32.totalorder %v2589_v29, %v77_v57  ;;  %vm160_vm12 = vcmp.eq.s32.totalorder %v2589_v29, %v74_v58 }
  0xb7   :  { %1947 = vmatprep.mubr.msk.f32.mxu0 %vm160_vm12, %v2270_v32 }
  0xb8   :  { %1948 = vmatmul.mubr.msk.f32.gmra.mrb[4].mxu0 %vm161_vm11, %v2270_v32 }
  0xb9   :  { %v155_v59 = vpop.permute.xlu1 %154  ;;  %v152_v60 = vpop.permute.xlu0 %151 }
  0xba   :  { %vm187_vm13 = vcmp.eq.s32.totalorder %v2589_v29, %v155_v59  ;;  %vm186_vm14 = vcmp.eq.s32.totalorder %v2589_v29, %v152_v60 }
  0xbb   :  { %1986 = vmatprep.mubr.msk.f32.mxu1 %vm186_vm14, %v2270_v32 }
  0xbc   :  { %1987 = vmatmul.mubr.msk.f32.gmra.mrb[22].mxu1 %vm187_vm13, %v2270_v32 }
  0xbd   :  { %v83_v61 = vpop.permute.xlu1 %82  ;;  %v80_v62 = vpop.permute.xlu0 %79 }
  0xbe   :  { %vm163_vm15 = vcmp.eq.s32.totalorder %v2589_v29, %v83_v61  ;;  %vm162_vm0 = vcmp.eq.s32.totalorder %v2589_v29, %v80_v62 }
  0xbf   :  { %1950 = vmatprep.mubr.msk.f32.mxu0 %vm162_vm0, %v2270_v32 }
  0xc0   :  { %1951 = vmatmul.mubr.msk.f32.gmra.mrb[6].mxu0 %vm163_vm15, %v2270_v32 }
  0xee   :  { %v1875_v63 = vpop.f32.mrb[8].mxu0 }
  0xef   :  { %v505_v0 = vpop.f32.mrb[9].mxu0 }
  0xf2   :  { %v1878_v1 = vpop.f32.mrb[10].mxu0 }
  0xf3   :  { %v515_v2 = vpop.f32.mrb[11].mxu0 }
  0xf6   :  { %v1881_v3 = vpop.f32.mrb[12].mxu0 }
  0xf7   :  { %v525_v4 = vpop.f32.mrb[13].mxu0 }
  0xfa   :  { %v1884_v5 = vpop.f32.mrb[14].mxu0 }
  0xfb   :  { %v535_v6 = vpop.f32.mrb[15].mxu0 }
  0xfe   :  { %v1887_v7 = vpop.f32.mrb[16].mxu0 }
  0xff   :  { %v545_v8 = vpop.f32.mrb[17].mxu0 }
 0x102   :  { %v1890_v9 = vpop.f32.mrb[18].mxu0 }
 0x103   :  { %v555_v10 = vpop.f32.mrb[19].mxu0 }
 0x106   :  { %v1893_v11 = vpop.f32.mrb[20].mxu0 }
 0x107   :  { %v565_v12 = vpop.f32.mrb[21].mxu0 }
 0x10a   :  { %v1896_v13 = vpop.f32.mrb[22].mxu0 }
 0x10b   :  { %v575_v14 = vpop.f32.mrb[23].mxu0 }
 0x10e   :  { %v1899_v15 = vpop.f32.mrb[24].mxu0 }
 0x10f   :  { %v585_v16 = vpop.f32.mrb[25].mxu0 }
 0x112   :  { %v1902_v17 = vpop.f32.mrb[26].mxu0 }
 0x113   :  { %v595_v18 = vpop.f32.mrb[27].mxu0 }
 0x116   :  { %v2655_v19 = vpop.f32.mrb[28].mxu0 }
 0x117   :  { %v2657_v20 = vpop.f32.mrb[29].mxu0 }
 0x11a   :  { %v2659_v21 = vpop.f32.mrb[30].mxu0 }
 0x11b   :  { %v2661_v22 = vpop.f32.mrb[31].mxu0 }
 0x15a   :  { %v1955_v23 = vpop.f32.mrb[0].mxu1 }
 0x15b   :  { %v736_v24 = vadd.f32 %v1955_v23, %v1875_v63  ;;  %v730_v25 = vpop.f32.mrb[1].mxu1 }
 0x15c   :  { %v731_v26 = vadd.f32 %v730_v25, %v505_v0 }
 0x15d   :  { %v2694_v57 = vadd.f32 %v2682_v50, %v736_v24 }
 0x15e   :  { %v1958_v27 = vpop.f32.mrb[2].mxu1  ;;  %v2687_v53 = vadd.f32 %v2682_v50, %v731_v26 }
 0x15f   :  { %v746_v28 = vadd.f32 %v1958_v27, %v1878_v1  ;;  %v740_v29 = vpop.f32.mrb[3].mxu1 }
 0x160   :  { %v741_v30 = vadd.f32 %v740_v29, %v515_v2  ;;  %v1749_v59 = vmul.f32 -1.442695, %v2687_v53 }
 0x162   :  { %v1961_v31 = vpop.f32.mrb[4].mxu1  ;;  %v2698_v60 = vadd.f32 %v2682_v50, %v741_v30  ;;  %2077 = vpow2.f32 %v1749_v59 }
 0x163   :  { %v2663_v32 = vadd.f32 %v1961_v31, %v1881_v3  ;;  %v750_v33 = vpop.f32.mrb[5].mxu1  ;;  %v1750_v3 = vmul.f32 -1.442695, %v2694_v57 }
 0x164   :  { %v751_v34 = vadd.f32 %v750_v33, %v525_v4  ;;  %v1751_v4 = vmul.f32 -1.442695, %v2698_v60 }
 0x165   :  { %2079 = vpow2.f32 %v1750_v3  ;;  %v2738_v29 = vadd.f32 %v2682_v50, %v2663_v32 }
 0x166   :  { %v1964_v35 = vpop.f32.mrb[6].mxu1  ;;  %2081 = vpow2.f32 %v1751_v4 }
 0x167   :  { %v2665_v36 = vadd.f32 %v1964_v35, %v1884_v5  ;;  %v760_v37 = vpop.f32.mrb[7].mxu1  ;;  %v1754_v32 = vmul.f32 -1.442695, %v2738_v29 }
 0x168   :  { %v2667_v38 = vadd.f32 %v760_v37, %v535_v6 }
 0x16a   :  { %v1967_v39 = vpop.f32.mrb[8].mxu1 }
 0x16b   :  { %v2669_v40 = vadd.f32 %v1967_v39, %v1887_v7  ;;  %v770_v41 = vpop.f32.mrb[9].mxu1 }
 0x16c   :  { %v2671_v42 = vadd.f32 %v770_v41, %v545_v8  ;;  %v2078_v26 = vpop.eup %2077 }
 0x16d   :  { %v992_v35 = vadd.f32 1.0, %v2078_v26 }
 0x16e   :  { %v1970_v43 = vpop.f32.mrb[10].mxu1 }
 0x16f   :  { %v2673_v44 = vadd.f32 %v1970_v43, %v1890_v9  ;;  %v780_v45 = vpop.f32.mrb[11].mxu1 }
 0x170   :  { %v2675_v46 = vadd.f32 %v780_v45, %v555_v10  ;;  %v2751_v45 = vadd.f32 %v2682_v50, %v2665_v36 }
 0x171   :  { %v2786_v26 = vadd.f32 %v2682_v50, %v2673_v44 }
 0x172   :  { %v1973_v47 = vpop.f32.mrb[12].mxu1 }
 0x173   :  { %v2677_v48 = vadd.f32 %v1973_v47, %v1893_v11  ;;  %v790_v49 = vpop.f32.mrb[13].mxu1  ;;  %v2718_v11 = vadd.f32 %v2682_v50, %v746_v28 }
 0x174   :  { %v2684_v51 = vadd.f32 %v790_v49, %v565_v12 }
 0x176   :  { %v1976_v52 = vpop.f32.mrb[14].mxu1 }
 0x177   :  { %v2689_v54 = vadd.f32 %v1976_v52, %v1896_v13  ;;  %v800_v55 = vpop.f32.mrb[15].mxu1 }
 0x178   :  { %v2691_v56 = vadd.f32 %v800_v55, %v575_v14  ;;  %v2721_v14 = vadd.f32 %v2682_v50, %v751_v34  ;;  %v2080_v34 = vpop.eup %2079  ;;  %v2755_v55 = vadd.f32 %v2682_v50, %v2667_v38 }
 0x179   :  { %v2082_v39 = vpop.eup %2081  ;;  %v993_v43 = vadd.f32 1.0, %v2080_v34 }
 0x17a   :  { %v1979_v58 = vpop.f32.mrb[16].mxu1  ;;  %v1753_v27 = vmul.f32 -1.442695, %v2721_v14  ;;  %v994_v52 = vadd.f32 1.0, %v2082_v39  ;;  %v2795_v39 = vadd.f32 %v2682_v50, %v2675_v46 }
 0x17b   :  { %v2700_v61 = vadd.f32 %v1979_v58, %v1899_v15  ;;  %v1943_v62 = vpop.f32.mrb[0].mxu0  ;;  %v810_v63 = vpop.f32.mrb[17].mxu1 }
 0x17c   :  { %v2703_v0 = vadd.f32 %v1943_v62, %v2682_v50  ;;  %v2705_v1 = vadd.f32 %v810_v63, %v585_v16  ;;  %v690_v2 = vpop.f32.mrb[1].mxu0 }
 0x17d   :  { %v2713_v9 = vadd.f32 %v2682_v50, %v690_v2  ;;  %v2765_v2 = vadd.f32 %v2682_v50, %v2669_v40 }
 0x17e   :  { %v1742_v6 = vmul.f32 -1.442695, %v2703_v0 }
 0x17f   :  { %v1982_v5 = vpop.f32.mrb[18].mxu1  ;;  %v1741_v15 = vmul.f32 -1.442695, %v2713_v9 }
 0x180   :  { %v2710_v7 = vadd.f32 %v1982_v5, %v1902_v17  ;;  %v820_v8 = vpop.f32.mrb[19].mxu1  ;;  %2083 = vpow2.f32 %v1742_v6  ;;  %v1752_v17 = vmul.f32 -1.442695, %v2718_v11  ;;  %v1755_v6 = vmul.f32 -1.442695, %v2755_v55 }
 0x181   :  { %v2715_v10 = vadd.f32 %v820_v8, %v595_v18  ;;  %2085 = vpow2.f32 %v1741_v15 }
 0x182   :  { %2087 = vpow2.f32 %v1752_v17 }
 0x183   :  { %v1946_v12 = vpop.f32.mrb[2].mxu0  ;;  %2089 = vpow2.f32 %v1753_v27 }
 0x184   :  { %v700_v13 = vpop.f32.mrb[3].mxu0  ;;  %v2725_v16 = vadd.f32 %v1946_v12, %v2682_v50 }
 0x185   :  { %v2729_v18 = vadd.f32 %v2682_v50, %v700_v13  ;;  %v1758_v13 = vmul.f32 -1.442695, %v2765_v2 }
 0x186   :  { %v1744_v30 = vmul.f32 -1.442695, %v2725_v16 }
 0x187   :  { %v1985_v23 = vpop.f32.mrb[20].mxu1 }
 0x188   :  { %v836_v24 = vadd.f32 %v1985_v23, %v2655_v19  ;;  %v830_v25 = vpop.f32.mrb[21].mxu1  ;;  %v1743_v19 = vmul.f32 -1.442695, %v2729_v18  ;;  %2091 = vpow2.f32 %v1744_v30  ;;  %v2782_v23 = vadd.f32 %v2682_v50, %v2671_v42 }
 0x189   :  { %v2734_v28 = vadd.f32 %v830_v25, %v2657_v20 }
 0x18a   :  { %v2742_v31 = vadd.f32 %v2682_v50, %v836_v24  ;;  %v2084_v41 = vpop.eup %2083  ;;  %2093 = vpow2.f32 %v1743_v19 }
 0x18b   :  { %v1949_v33 = vpop.f32.mrb[4].mxu0  ;;  %v985_v47 = vadd.f32 1.0, %v2084_v41  ;;  %2095 = vrcp.f32 %v992_v35  ;;  %v2086_v38 = vpop.eup %2085  ;;  %v1760_v41 = vmul.f32 -1.442695, %v2786_v26 }
 0x18c   :  { %v710_v37 = vpop.f32.mrb[5].mxu0  ;;  %v2746_v20 = vadd.f32 %v1949_v33, %v2682_v50  ;;  %v2088_v12 = vpop.eup %2087 }
 0x18d   :  { %2097 = vrcp.f32 %v985_v47  ;;  %v2760_v63 = vadd.f32 %v2682_v50, %v710_v37  ;;  %v2090_v17 = vpop.eup %2089  ;;  %v995_v25 = vadd.f32 1.0, %v2088_v12  ;;  %v1757_v37 = vmul.f32 -1.442695, %v2782_v23 }
 0x18e   :  { %v1746_v62 = vmul.f32 -1.442695, %v2746_v20  ;;  %2099 = vpow2.f32 %v1754_v32  ;;  %v2800_v32 = vadd.f32 %v2682_v50, %v2677_v48  ;;  %v996_v46 = vadd.f32 1.0, %v2090_v17 }
 0x18f   :  { %v1988_v49 = vpop.f32.mrb[22].mxu1  ;;  %2101 = vrcp.f32 %v993_v43  ;;  %v1745_v40 = vmul.f32 -1.442695, %v2760_v63  ;;  %v1759_v48 = vmul.f32 -1.442695, %v2795_v39 }
 0x190   :  { %v846_v58 = vadd.f32 %v1988_v49, %v2659_v21  ;;  %v840_v59 = vpop.f32.mrb[23].mxu1  ;;  %v1756_v21 = vmul.f32 -1.442695, %v2751_v45  ;;  %2103 = vrcp.f32 %v994_v52 }
 0x191   :  { %v841_v36 = vadd.f32 %v840_v59, %v2661_v22  ;;  %v984_v22 = vadd.f32 1.0, %v2086_v38  ;;  %2105 = vpow2.f32 %v1746_v62 }
 0x192   :  { %v2768_v3 = vadd.f32 %v2682_v50, %v846_v58  ;;  %v2092_v24 = vpop.eup %2091 }
 0x193   :  { %v2772_v4 = vadd.f32 %v2682_v50, %v841_v36  ;;  %v1952_v5 = vpop.f32.mrb[6].mxu0  ;;  %2107 = vrcp.f32 %v984_v22  ;;  %v987_v30 = vadd.f32 1.0, %v2092_v24  ;;  %v1762_v36 = vmul.f32 -1.442695, %v2800_v32 }
 0x194   :  { %v720_v8 = vpop.f32.mrb[7].mxu0  ;;  %v2778_v15 = vadd.f32 %v1952_v5, %v2682_v50  ;;  %2109 = vpow2.f32 %v1756_v21  ;;  %v2094_v27 = vpop.eup %2093  ;;  %v2815_v21 = vadd.f32 %v2682_v50, %v2684_v51  ;;  %v2832_v24 = vadd.f32 %v2682_v50, %v2691_v56 }
 0x195   :  { %2111 = vpow2.f32 %v1755_v6  ;;  %v2789_v19 = vadd.f32 %v2682_v50, %v720_v8  ;;  %v2096_v33 = vpop.eup %2095  ;;  %v986_v34 = vadd.f32 1.0, %v2094_v27  ;;  %v2842_v56 = vadd.f32 %v2682_v50, %v2689_v54 }
 0x196   :  { %2113 = vpow2.f32 %v1745_v40  ;;  %v1748_v35 = vmul.f32 -1.442695, %v2778_v15  ;;  %v2809_v59 = vmul.f32 %v2096_v33, %v2687_v53  ;;  %v1761_v27 = vmul.f32 -1.442695, %v2815_v21 }
 0x197   :  { %2115 = vpow2.f32 %v1758_v13  ;;  %v2098_v42 = vpop.eup %2097  ;;  %v1747_v49 = vmul.f32 -1.442695, %v2789_v19 }
 0x198   :  { %2117 = vrcp.f32 %v987_v30  ;;  %v2100_v44 = vpop.eup %2099  ;;  %v2803_v43 = vmul.f32 %v2098_v42, %v2703_v0  ;;  %v1137_v22 = vsel %vm1112_vm1, %v2809_v59, 0.0 }
 0x199   :  { %2119 = vrcp.f32 %v995_v25  ;;  %v2102_v47 = vpop.eup %2101  ;;  %v997_v40 = vadd.f32 1.0, %v2100_v44 }
 0x19a   :  { %2121 = vrcp.f32 %v986_v34  ;;  %v2104_v52 = vpop.eup %2103  ;;  %v1116_v58 = vsel %vm1112_vm1, %v2803_v43, 0.0  ;;  %v2828_v13 = vmul.f32 %v2102_v47, %v2694_v57 }
 0x19b   :  { %2123 = vpow2.f32 %v1748_v35  ;;  %v2106_v62 = vpop.eup %2105  ;;  %1117 = vadd.xlane.f32.xlu1 %v1116_v58  ;;  %v2823_v8 = vmul.f32 %v2104_v52, %v2698_v60  ;;  %v1764_v58 = vmul.f32 -1.442695, %v2842_v56 }
 0x19c   :  { %2125 = vpow2.f32 %v1757_v37  ;;  %v989_v5 = vadd.f32 1.0, %v2106_v62  ;;  %v1140_v37 = vsel %vm1112_vm1, %v2828_v13, 0.0 }
 0x19d   :  { %v2108_v0 = vpop.eup %2107  ;;  %2127 = vpow2.f32 %v1760_v41  ;;  %v1143_v57 = vsel %vm1112_vm1, %v2823_v8, 0.0  ;;  %v1763_v41 = vmul.f32 -1.442695, %v2832_v24 }
 0x19e   :  { %v2110_v38 = vpop.eup %2109  ;;  %2129 = vpow2.f32 %v1747_v49  ;;  %v2818_v6 = vmul.f32 %v2108_v0, %v2713_v9 }
 0x19f   :  { %v2112_v53 = vpop.eup %2111  ;;  %2131 = vrcp.f32 %v996_v46  ;;  %1138 = vadd.xlane.f32.xlu1 %v1137_v22  ;;  %v999_v17 = vadd.f32 1.0, %v2110_v38 }
 0x1a0   :  { %v2114_v12 = vpop.eup %2113  ;;  %2133 = vpow2.f32 %v1759_v48  ;;  %v1113_v51 = vsel %vm1112_vm1, %v2818_v6, 0.0  ;;  %v998_v33 = vadd.f32 1.0, %v2112_v53  ;;  %v2864_v53 = vadd.f32 %v2682_v50, %v2715_v10 }
 0x1a1   :  { %v2116_v9 = vpop.eup %2115  ;;  %2135 = vpow2.f32 %v1762_v36  ;;  %v988_v25 = vadd.f32 1.0, %v2114_v12  ;;  %1114 = vadd.xlane.f32.xlu0 %v1113_v51  ;;  %v2874_v10 = vadd.f32 %v2682_v50, %v2710_v7 }
 0x1a2   :  { %v2118_v60 = vpop.eup %2117  ;;  %2137 = vrcp.f32 %v989_v5  ;;  %v1001_v42 = vadd.f32 1.0, %v2116_v9 }
 0x1a3   :  { %v2120_v30 = vpop.eup %2119  ;;  %2139 = vrcp.f32 %v988_v25  ;;  %v2838_v34 = vmul.f32 %v2118_v60, %v2725_v16  ;;  %1144 = vadd.xlane.f32.xlu1 %v1143_v57  ;;  %v2849_v16 = vadd.f32 %v2682_v50, %v2705_v1  ;;  %v2859_v1 = vadd.f32 %v2682_v50, %v2700_v61 }
 0x1a4   :  { %v2122_v35 = vpop.eup %2121  ;;  %2141 = vrcp.f32 %v997_v40  ;;  %v2869_v61 = vmul.f32 %v2120_v30, %v2718_v11  ;;  %v1767_v25 = vmul.f32 -1.442695, %v2864_v53  ;;  %v2879_v60 = vadd.f32 %v2682_v50, %v2734_v28 }
 0x1a5   :  { %v2124_v44 = vpop.eup %2123  ;;  %2143 = vrcp.f32 %v999_v17  ;;  %1141 = vadd.xlane.f32.xlu0 %v1140_v37  ;;  %v1122_v54 = vsel %vm1112_vm1, %v2838_v34, 0.0  ;;  %v2855_v62 = vmul.f32 %v2122_v35, %v2729_v18  ;;  %v1765_v5 = vmul.f32 -1.442695, %v2849_v16 }
 0x1a6   :  { %v2126_v47 = vpop.eup %2125  ;;  %2145 = vpow2.f32 %v1761_v27  ;;  %v991_v49 = vadd.f32 1.0, %v2124_v44  ;;  %v1766_v9 = vmul.f32 -1.442695, %v2859_v1  ;;  %v1146_v35 = vsel %vm1112_vm1, %v2869_v61, 0.0 }
 0x1a7   :  { %v2128_v52 = vpop.eup %2127  ;;  %2147 = vrcp.f32 %v998_v33  ;;  %v1000_v0 = vadd.f32 1.0, %v2126_v47  ;;  %v1119_v40 = vsel %vm1112_vm1, %v2855_v62, 0.0 }
 0x1a8   :  { %v2130_v46 = vpop.eup %2129  ;;  %2149 = vrcp.f32 %v1001_v42  ;;  %v1003_v18 = vadd.f32 1.0, %v2128_v52 }
 0x1a9   :  { %v2132_v48 = vpop.eup %2131  ;;  %2151 = vpow2.f32 %v1763_v41  ;;  %v990_v36 = vadd.f32 1.0, %v2130_v46  ;;  %1123 = vadd.xlane.f32.xlu0 %v1122_v54  ;;  %v1770_v46 = vmul.f32 -1.442695, %v2742_v31 }
 0x1aa   :  { %v2134_v38 = vpop.eup %2133  ;;  %2153 = vrcp.f32 %v991_v49  ;;  %v2885_v33 = vmul.f32 %v2132_v48, %v2721_v14  ;;  %v1769_v14 = vmul.f32 -1.442695, %v2879_v60  ;;  %v1771_v48 = vmul.f32 -1.442695, %v2772_v4 }
 0x1ab   :  { %v2136_v22 = vpop.eup %2135  ;;  %2155 = vrcp.f32 %v990_v36  ;;  %v1002_v30 = vadd.f32 1.0, %v2134_v38 }
 0x1ac   :  { %v2138_v12 = vpop.eup %2137  ;;  %2157 = vpow2.f32 %v1764_v58  ;;  %v1005_v57 = vadd.f32 1.0, %v2136_v22 }
 0x1ad   :  { %v2140_v51 = vpop.eup %2139  ;;  %2159 = vrcp.f32 %v1000_v0  ;;  %1120 = vadd.xlane.f32.xlu0 %v1119_v40  ;;  %v2892_v50 = vmul.f32 %v2138_v12, %v2746_v20  ;;  %v1149_v20 = vsel %vm1112_vm1, %v2885_v33, 0.0 }
 0x1ae   :  { %v2142_v17 = vpop.eup %2141  ;;  %2161 = vpow2.f32 %v1765_v5  ;;  %v2882_v11 = vmul.f32 %v2140_v51, %v2760_v63  ;;  %v1768_v63 = vmul.f32 -1.442695, %v2874_v10 }
 0x1af   :  { %v2144_v27 = vpop.eup %2143  ;;  %2163 = vrcp.f32 %v1003_v18  ;;  %v1128_v49 = vsel %vm1112_vm1, %v2892_v50, 0.0  ;;  %v2901_v54 = vmul.f32 %v2142_v17, %v2738_v29 }
 0x1b0   :  { %v2146_v7 = vpop.eup %2145  ;;  %v1125_v42 = vsel %vm1112_vm1, %v2882_v11, 0.0  ;;  %2165 = vpow2.f32 %v1766_v9 }
 0x1b1   :  { %v2148_v28 = vpop.eup %2147  ;;  %1147 = vadd.xlane.f32.xlu0 %v1146_v35  ;;  %1126 = vadd.xlane.f32.xlu1 %v1125_v42  ;;  %2167 = vpow2.f32 %v1767_v25  ;;  %v1004_v41 = vadd.f32 1.0, %v2146_v7  ;;  %v1152_v29 = vsel %vm1112_vm1, %v2901_v54, 0.0 }
 0x1b2   :  { %v2150_v37 = vpop.eup %2149  ;;  %2169 = vrcp.f32 %v1002_v30  ;;  %v2916_v12 = vmul.f32 %v2148_v28, %v2755_v55  ;;  %v2924_v55 = vmul.f32 %v2144_v27, %v2751_v45 }
 0x1b3   :  { %v2152_v44 = vpop.eup %2151  ;;  %2171 = vrcp.f32 %v1005_v57 }
 0x1b4   :  { %v2154_v47 = vpop.eup %2153  ;;  %2173 = vpow2.f32 %v1768_v63  ;;  %v1006_v38 = vadd.f32 1.0, %v2152_v44  ;;  %v1158_v44 = vsel %vm1112_vm1, %v2924_v55, 0.0 }
 0x1b5   :  { %v2156_v52 = vpop.eup %2155  ;;  %1129 = vadd.xlane.f32.xlu0 %v1128_v49  ;;  %1150 = vadd.xlane.f32.xlu1 %v1149_v20  ;;  %2175 = vpow2.f32 %v1769_v14  ;;  %v2913_v18 = vmul.f32 %v2154_v47, %v2778_v15  ;;  %v1155_v15 = vsel %vm1112_vm1, %v2916_v12, 0.0 }
 0x1b6   :  { %v2158_v58 = vpop.eup %2157  ;;  %v2906_v0 = vmul.f32 %v2156_v52, %v2789_v19  ;;  %2177 = vrcp.f32 %v1004_v41  ;;  %v1772_v19 = vmul.f32 -1.442695, %v2768_v3 }
 0x1b7   :  { %v2160_v36 = vpop.eup %2159  ;;  %v1007_v51 = vadd.f32 1.0, %v2158_v58  ;;  %2179 = vpow2.f32 %v1770_v46  ;;  %v1134_v30 = vsel %vm1112_vm1, %v2913_v18, 0.0 }
 0x1b8   :  { %v2162_v5 = vpop.eup %2161  ;;  %v1131_v22 = vsel %vm1112_vm1, %v2906_v0, 0.0  ;;  %2181 = vpow2.f32 %v1771_v48  ;;  %v2927_v7 = vmul.f32 %v2160_v36, %v2782_v23  ;;  %v2934_v23 = vmul.f32 %v2150_v37, %v2765_v2 }
 0x1b9   :  { %v2164_v40 = vpop.eup %2163  ;;  %1153 = vadd.xlane.f32.xlu0 %v1152_v29  ;;  %1132 = vadd.xlane.f32.xlu1 %v1131_v22  ;;  %2183 = vrcp.f32 %v1006_v38  ;;  %v1008_v17 = vadd.f32 1.0, %v2162_v5 }
 0x1ba   :  { %v2166_v9 = vpop.eup %2165  ;;  %2185 = vrcp.f32 %v1007_v51  ;;  %v1161_v45 = vsel %vm1112_vm1, %v2927_v7, 0.0  ;;  %v1164_v46 = vsel %vm1112_vm1, %v2934_v23, 0.0  ;;  %v2944_v2 = vmul.f32 %v2164_v40, %v2786_v26 }
 0x1bb   :  { %v2168_v25 = vpop.eup %2167  ;;  %v1009_v42 = vadd.f32 1.0, %v2166_v9  ;;  %2187 = vpow2.f32 %v1772_v19 }
 0x1bc   :  { %v2170_v57 = vpop.eup %2169  ;;  %2189 = vrcp.f32 %v1008_v17  ;;  %v1010_v63 = vadd.f32 1.0, %v2168_v25  ;;  %v1170_v29 = vsel %vm1112_vm1, %v2944_v2, 0.0 }
 0x1bd   :  { %1135 = vadd.xlane.f32.xlu0 %v1134_v30  ;;  %1156 = vadd.xlane.f32.xlu1 %v1155_v15  ;;  %v2172_v35 = vpop.eup %2171  ;;  %v2937_v27 = vmul.f32 %v2170_v57, %v2795_v39  ;;  %2191 = vrcp.f32 %v1009_v42 }
 0x1be   :  { %v2174_v28 = vpop.eup %2173  ;;  %2193 = vrcp.f32 %v1010_v63  ;;  %v2954_v26 = vmul.f32 %v2172_v35, %v2800_v32 }
 0x1bf   :  { %v2176_v14 = vpop.eup %2175  ;;  %v1011_v47 = vadd.f32 1.0, %v2174_v28  ;;  %v1167_v58 = vsel %vm1112_vm1, %v2937_v27, 0.0 }
 0x1c0   :  { %v2178_v41 = vpop.eup %2177  ;;  %v1012_v20 = vadd.f32 1.0, %v2176_v14  ;;  %v1176_v9 = vsel %vm1112_vm1, %v2954_v26, 0.0 }
 0x1c1   :  { %1159 = vadd.xlane.f32.xlu0 %v1158_v44  ;;  %1162 = vadd.xlane.f32.xlu1 %v1161_v45  ;;  %v2180_v49 = vpop.eup %2179  ;;  %v2947_v39 = vmul.f32 %v2178_v41, %v2815_v21  ;;  %2195 = vrcp.f32 %v1011_v47 }
 0x1c2   :  { %v2182_v52 = vpop.eup %2181  ;;  %v1013_v48 = vadd.f32 1.0, %v2180_v49  ;;  %2197 = vrcp.f32 %v1012_v20 }
 0x1c3   :  { %v2184_v37 = vpop.eup %2183  ;;  %v1014_v38 = vadd.f32 1.0, %v2182_v52  ;;  %v1173_v22 = vsel %vm1112_vm1, %v2947_v39, 0.0 }
 0x1c4   :  { %v2186_v36 = vpop.eup %2185  ;;  %v2957_v21 = vmul.f32 %v2184_v37, %v2832_v24  ;;  %2199 = vrcp.f32 %v1013_v48 }
 0x1c5   :  { %1165 = vadd.xlane.f32.xlu0 %v1164_v46  ;;  %1168 = vadd.xlane.f32.xlu1 %v1167_v58  ;;  %v2188_v5 = vpop.eup %2187  ;;  %2201 = vrcp.f32 %v1014_v38  ;;  %v2964_v25 = vmul.f32 %v2186_v36, %v2842_v56 }
 0x1c6   :  { %v2190_v40 = vpop.eup %2189  ;;  %v1015_v51 = vadd.f32 1.0, %v2188_v5  ;;  %v1179_v17 = vsel %vm1112_vm1, %v2957_v21, 0.0 }
 0x1c7   :  { %v2192_v19 = vpop.eup %2191  ;;  %v2967_v32 = vmul.f32 %v2190_v40, %v2849_v16  ;;  %v1182_v15 = vsel %vm1112_vm1, %v2964_v25, 0.0 }
 0x1c8   :  { %v2194_v24 = vpop.eup %2193  ;;  %2203 = vrcp.f32 %v1015_v51  ;;  %v2974_v35 = vmul.f32 %v2192_v19, %v2859_v1 }
 0x1c9   :  { %1171 = vadd.xlane.f32.xlu0 %v1170_v29  ;;  %1174 = vadd.xlane.f32.xlu1 %v1173_v22  ;;  %v1185_v57 = vsel %vm1112_vm1, %v2967_v32, 0.0  ;;  %v2977_v56 = vmul.f32 %v2194_v24, %v2864_v53 }
 0x1ca   :  { %v1188_v28 = vsel %vm1112_vm1, %v2974_v35, 0.0 }
 0x1cb   :  { %v2196_v30 = vpop.eup %2195  ;;  %v1191_v63 = vsel %vm1112_vm1, %v2977_v56, 0.0 }
 0x1cc   :  { %v2198_v42 = vpop.eup %2197  ;;  %v2984_v14 = vmul.f32 %v2196_v30, %v2874_v10 }
 0x1cd   :  { %1177 = vadd.xlane.f32.xlu0 %v1176_v9  ;;  %1180 = vadd.xlane.f32.xlu1 %v1179_v17  ;;  %v2987_v44 = vmul.f32 %v2198_v42, %v2879_v60 }
 0x1ce   :  { %v2200_v16 = vpop.eup %2199  ;;  %v1194_v53 = vsel %vm1112_vm1, %v2984_v14, 0.0 }
 0x1cf   :  { %v2202_v1 = vpop.eup %2201  ;;  %v1197_v45 = vsel %vm1112_vm1, %v2987_v44, 0.0  ;;  %v2994_v41 = vmul.f32 %v2200_v16, %v2742_v31 }
 0x1d0   :  { %v2997_v47 = vmul.f32 %v2202_v1, %v2772_v4 }
 0x1d1   :  { %1183 = vadd.xlane.f32.xlu0 %v1182_v15  ;;  %1186 = vadd.xlane.f32.xlu1 %v1185_v57  ;;  %v1200_v60 = vsel %vm1112_vm1, %v2994_v41, 0.0 }
 0x1d2   :  { %v2204_v10 = vpop.eup %2203  ;;  %v1203_v49 = vsel %vm1112_vm1, %v2997_v47, 0.0 }
 0x1d3   :  { %v3004_v20 = vmul.f32 %v2204_v10, %v2768_v3 }
 0x1d5   :  { %1189 = vadd.xlane.f32.xlu0 %v1188_v28  ;;  %1192 = vadd.xlane.f32.xlu1 %v1191_v63  ;;  %v1206_v31 = vsel %vm1112_vm1, %v3004_v20, 0.0 }
 0x1d9   :  { %1195 = vadd.xlane.f32.xlu0 %v1194_v53  ;;  %1198 = vadd.xlane.f32.xlu1 %v1197_v45 }
 0x1dd   :  { %1201 = vadd.xlane.f32.xlu0 %v1200_v60  ;;  %1204 = vadd.xlane.f32.xlu1 %v1203_v49 }
 0x1e1   :  { %1207 = vadd.xlane.f32.xlu0 %v1206_v31 }
 0x228   :  { %v1118_v4 = vpop.xlane.xlu1 %1117 }
 0x229   :  { %v1211_v52 = vmul.f32 0.015625, %v1118_v4 }
 0x22b   :  { %v3009_v46 = vsub.f32 %v2803_v43, %v1211_v52 }
 0x22c   :  { %v1139_v58 = vpop.xlane.xlu1 %1138 }
 0x22d   :  { %v1218_v48 = vmul.f32 0.015625, %v1139_v58  ;;  %v1275_v36 = vmul.f32 %v3009_v46, %v3009_v46 }
 0x22e   :  { %v1115_v37 = vpop.xlane.xlu0 %1114 }
 0x22f   :  { %v1210_v38 = vmul.f32 0.015625, %v1115_v37  ;;  %v3014_v3 = vsub.f32 %v2809_v59, %v1218_v48  ;;  %v1309_v5 = vsel %vm1112_vm1, %v1275_v36, 0.0 }
 0x230   :  { %1310 = vadd.xlane.f32.xlu0 %v1309_v5  ;;  %v1145_v9 = vpop.xlane.xlu1 %1144 }
 0x231   :  { %v3018_v29 = vsub.f32 %v2818_v6, %v1210_v38  ;;  %v1282_v51 = vmul.f32 %v3014_v3, %v3014_v3  ;;  %v1220_v15 = vmul.f32 0.015625, %v1145_v9 }
 0x232   :  { %v1142_v22 = vpop.xlane.xlu0 %1141 }
 0x233   :  { %v1219_v40 = vmul.f32 0.015625, %v1142_v22  ;;  %v1274_v43 = vmul.f32 %v3018_v29, %v3018_v29  ;;  %v1330_v6 = vsel %vm1112_vm1, %v1282_v51, 0.0  ;;  %v3038_v63 = vsub.f32 %v2823_v8, %v1220_v15 }
 0x235   :  { %v3025_v19 = vsub.f32 %v2828_v13, %v1219_v40  ;;  %v1306_v59 = vsel %vm1112_vm1, %v1274_v43, 0.0  ;;  %v1284_v31 = vmul.f32 %v3038_v63, %v3038_v63 }
 0x236   :  { %1307 = vadd.xlane.f32.xlu1 %v1306_v59  ;;  %v1124_v17 = vpop.xlane.xlu0 %1123 }
 0x237   :  { %v1213_v24 = vmul.f32 0.015625, %v1124_v17  ;;  %v1283_v30 = vmul.f32 %v3025_v19, %v3025_v19  ;;  %v1336_v38 = vsel %vm1112_vm1, %v1284_v31, 0.0 }
 0x239   :  { %v3032_v57 = vsub.f32 %v2838_v34, %v1213_v24  ;;  %v1333_v42 = vsel %vm1112_vm1, %v1283_v30, 0.0 }
 0x23a   :  { %1331 = vadd.xlane.f32.xlu1 %v1330_v6  ;;  %1334 = vadd.xlane.f32.xlu0 %v1333_v42  ;;  %v1121_v13 = vpop.xlane.xlu0 %1120 }
 0x23b   :  { %v1212_v16 = vmul.f32 0.015625, %v1121_v13  ;;  %v1277_v28 = vmul.f32 %v3032_v57, %v3032_v57 }
 0x23d   :  { %v3041_v1 = vsub.f32 %v2855_v62, %v1212_v16  ;;  %v1315_v53 = vsel %vm1112_vm1, %v1277_v28, 0.0 }
 0x23e   :  { %v1127_v45 = vpop.xlane.xlu1 %1126  ;;  %1316 = vadd.xlane.f32.xlu0 %v1315_v53  ;;  %v1148_v34 = vpop.xlane.xlu0 %1147 }
 0x23f   :  { %v1214_v10 = vmul.f32 0.015625, %v1127_v45  ;;  %v1221_v60 = vmul.f32 0.015625, %v1148_v34  ;;  %v1276_v49 = vmul.f32 %v3041_v1, %v3041_v1 }
 0x241   :  { %v3049_v4 = vsub.f32 %v2882_v11, %v1214_v10  ;;  %v3052_v8 = vsub.f32 %v2869_v61, %v1221_v60  ;;  %v1312_v62 = vsel %vm1112_vm1, %v1276_v49, 0.0 }
 0x242   :  { %v1151_v52 = vpop.xlane.xlu1 %1150  ;;  %1313 = vadd.xlane.f32.xlu1 %v1312_v62  ;;  %v1130_v58 = vpop.xlane.xlu0 %1129 }
 0x243   :  { %v1222_v37 = vmul.f32 0.015625, %v1151_v52  ;;  %v1215_v48 = vmul.f32 0.015625, %v1130_v58  ;;  %v1285_v36 = vmul.f32 %v3052_v8, %v3052_v8  ;;  %v1278_v22 = vmul.f32 %v3049_v4, %v3049_v4 }
 0x245   :  { %v3059_v5 = vsub.f32 %v2885_v33, %v1222_v37  ;;  %v3062_v11 = vsub.f32 %v2892_v50, %v1215_v48  ;;  %v1339_v61 = vsel %vm1112_vm1, %v1285_v36, 0.0  ;;  %v1318_v24 = vsel %vm1112_vm1, %v1278_v22, 0.0 }
 0x246   :  { %v1133_v40 = vpop.xlane.xlu1 %1132  ;;  %1337 = vadd.xlane.f32.xlu1 %v1336_v38  ;;  %1340 = vadd.xlane.f32.xlu0 %v1339_v61  ;;  %v1154_v43 = vpop.xlane.xlu0 %1153 }
 0x247   :  { %v1216_v51 = vmul.f32 0.015625, %v1133_v40  ;;  %v1223_v9 = vmul.f32 0.015625, %v1154_v43  ;;  %v1279_v59 = vmul.f32 %v3062_v11, %v3062_v11  ;;  %v1286_v33 = vmul.f32 %v3059_v5, %v3059_v5 }
 0x249   :  { %v3072_v50 = vsub.f32 %v2906_v0, %v1216_v51  ;;  %v3075_v17 = vsub.f32 %v2901_v54, %v1223_v9  ;;  %v1321_v6 = vsel %vm1112_vm1, %v1279_v59, 0.0  ;;  %v1342_v28 = vsel %vm1112_vm1, %v1286_v33, 0.0 }
 0x24a   :  { %v1157_v30 = vpop.xlane.xlu1 %1156  ;;  %1319 = vadd.xlane.f32.xlu1 %v1318_v24  ;;  %1322 = vadd.xlane.f32.xlu0 %v1321_v6  ;;  %v1136_v15 = vpop.xlane.xlu0 %1135 }
 0x24b   :  { %v1224_v42 = vmul.f32 0.015625, %v1157_v30  ;;  %v1217_v13 = vmul.f32 0.015625, %v1136_v15  ;;  %v1287_v16 = vmul.f32 %v3075_v17, %v3075_v17  ;;  %v1280_v45 = vmul.f32 %v3072_v50, %v3072_v50 }
 0x24d   :  { %v3083_v0 = vsub.f32 %v2916_v12, %v1224_v42  ;;  %v3086_v54 = vsub.f32 %v2913_v18, %v1217_v13  ;;  %v1345_v53 = vsel %vm1112_vm1, %v1287_v16, 0.0  ;;  %v1324_v52 = vsel %vm1112_vm1, %v1280_v45, 0.0 }
 0x24e   :  { %v1163_v34 = vpop.xlane.xlu1 %1162  ;;  %1343 = vadd.xlane.f32.xlu1 %v1342_v28  ;;  %1346 = vadd.xlane.f32.xlu0 %v1345_v53  ;;  %v1160_v10 = vpop.xlane.xlu0 %1159 }
 0x24f   :  { %v1226_v60 = vmul.f32 0.015625, %v1163_v34  ;;  %v1225_v49 = vmul.f32 0.015625, %v1160_v10  ;;  %v1281_v31 = vmul.f32 %v3086_v54, %v3086_v54  ;;  %v1288_v12 = vmul.f32 %v3083_v0, %v3083_v0 }
 0x251   :  { %v3096_v18 = vsub.f32 %v2927_v7, %v1226_v60  ;;  %v3099_v62 = vsub.f32 %v2924_v55, %v1225_v49  ;;  %v1327_v58 = vsel %vm1112_vm1, %v1281_v31, 0.0  ;;  %v1348_v22 = vsel %vm1112_vm1, %v1288_v12, 0.0 }
 0x252   :  { %v1169_v37 = vpop.xlane.xlu1 %1168  ;;  %1325 = vadd.xlane.f32.xlu1 %v1324_v52  ;;  %1328 = vadd.xlane.f32.xlu0 %v1327_v58  ;;  %v1166_v48 = vpop.xlane.xlu0 %1165 }
 0x253   :  { %v1228_v36 = vmul.f32 0.015625, %v1169_v37  ;;  %v1227_v38 = vmul.f32 0.015625, %v1166_v48  ;;  %v1289_v61 = vmul.f32 %v3099_v62, %v3099_v62  ;;  %v1290_v43 = vmul.f32 %v3096_v18, %v3096_v18 }
 0x255   :  { %v3107_v7 = vsub.f32 %v2937_v27, %v1228_v36  ;;  %v3110_v55 = vsub.f32 %v2934_v23, %v1227_v38  ;;  %v1351_v40 = vsel %vm1112_vm1, %v1289_v61, 0.0  ;;  %v1354_v30 = vsel %vm1112_vm1, %v1290_v43, 0.0 }
 0x256   :  { %v1175_v51 = vpop.xlane.xlu1 %1174  ;;  %1349 = vadd.xlane.f32.xlu1 %v1348_v22  ;;  %1352 = vadd.xlane.f32.xlu0 %v1351_v40  ;;  %v1172_v9 = vpop.xlane.xlu0 %1171 }
 0x257   :  { %v1230_v59 = vmul.f32 0.015625, %v1175_v51  ;;  %v1229_v33 = vmul.f32 0.015625, %v1172_v9  ;;  %v1291_v24 = vmul.f32 %v3110_v55, %v3110_v55  ;;  %v1292_v27 = vmul.f32 %v3107_v7, %v3107_v7 }
 0x259   :  { %v3120_v23 = vsub.f32 %v2947_v39, %v1230_v59  ;;  %v3123_v6 = vsub.f32 %v2944_v2, %v1229_v33  ;;  %v1357_v15 = vsel %vm1112_vm1, %v1291_v24, 0.0  ;;  %v1360_v45 = vsel %vm1112_vm1, %v1292_v27, 0.0 }
 0x25a   :  { %v1181_v42 = vpop.xlane.xlu1 %1180  ;;  %1355 = vadd.xlane.f32.xlu1 %v1354_v30  ;;  %1358 = vadd.xlane.f32.xlu0 %v1357_v15  ;;  %v1178_v13 = vpop.xlane.xlu0 %1177 }
 0x25b   :  { %v1232_v16 = vmul.f32 0.015625, %v1181_v42  ;;  %v1231_v28 = vmul.f32 0.015625, %v1178_v13  ;;  %v1293_v53 = vmul.f32 %v3123_v6, %v3123_v6  ;;  %v1294_v10 = vmul.f32 %v3120_v23, %v3120_v23 }
 0x25d   :  { %v3131_v39 = vsub.f32 %v2957_v21, %v1232_v16  ;;  %v3134_v2 = vsub.f32 %v2954_v26, %v1231_v28  ;;  %v1363_v34 = vsel %vm1112_vm1, %v1293_v53, 0.0  ;;  %v1366_v37 = vsel %vm1112_vm1, %v1294_v10, 0.0 }
 0x25e   :  { %v1187_v60 = vpop.xlane.xlu1 %1186  ;;  %1361 = vadd.xlane.f32.xlu1 %v1360_v45  ;;  %1364 = vadd.xlane.f32.xlu0 %v1363_v34  ;;  %v1184_v49 = vpop.xlane.xlu0 %1183 }
 0x25f   :  { %v1234_v31 = vmul.f32 0.015625, %v1187_v60  ;;  %v1233_v12 = vmul.f32 0.015625, %v1184_v49  ;;  %v1295_v52 = vmul.f32 %v3134_v2, %v3134_v2  ;;  %v1296_v21 = vmul.f32 %v3131_v39, %v3131_v39 }
 0x261   :  { %v3144_v26 = vsub.f32 %v2967_v32, %v1234_v31  ;;  %v3147_v58 = vsub.f32 %v2964_v25, %v1233_v12  ;;  %v1369_v48 = vsel %vm1112_vm1, %v1295_v52, 0.0  ;;  %v1372_v43 = vsel %vm1112_vm1, %v1296_v21, 0.0 }
 0x262   :  { %v1193_v36 = vpop.xlane.xlu1 %1192  ;;  %1367 = vadd.xlane.f32.xlu1 %v1366_v37  ;;  %1370 = vadd.xlane.f32.xlu0 %v1369_v48  ;;  %v1190_v38 = vpop.xlane.xlu0 %1189 }
 0x263   :  { %v1236_v61 = vmul.f32 0.015625, %v1193_v36  ;;  %v1235_v22 = vmul.f32 0.015625, %v1190_v38  ;;  %v1297_v40 = vmul.f32 %v3147_v58, %v3147_v58  ;;  %v1298_v9 = vmul.f32 %v3144_v26, %v3144_v26 }
 0x265   :  { %v3155_v32 = vsub.f32 %v2977_v56, %v1236_v61  ;;  %v3158_v25 = vsub.f32 %v2974_v35, %v1235_v22  ;;  %v1375_v51 = vsel %vm1112_vm1, %v1297_v40, 0.0  ;;  %v1378_v42 = vsel %vm1112_vm1, %v1298_v9, 0.0 }
 0x266   :  { %v1199_v59 = vpop.xlane.xlu1 %1198  ;;  %1373 = vadd.xlane.f32.xlu1 %v1372_v43  ;;  %1376 = vadd.xlane.f32.xlu0 %v1375_v51  ;;  %v1196_v33 = vpop.xlane.xlu0 %1195 }
 0x267   :  { %v1238_v24 = vmul.f32 0.015625, %v1199_v59  ;;  %v1237_v27 = vmul.f32 0.015625, %v1196_v33  ;;  %v1299_v30 = vmul.f32 %v3158_v25, %v3158_v25  ;;  %v1300_v56 = vmul.f32 %v3155_v32, %v3155_v32 }
 0x269   :  { %v3168_v35 = vsub.f32 %v2987_v44, %v1238_v24  ;;  %v3171_v15 = vsub.f32 %v2984_v14, %v1237_v27  ;;  %v1381_v13 = vsel %vm1112_vm1, %v1299_v30, 0.0  ;;  %v1384_v10 = vsel %vm1112_vm1, %v1300_v56, 0.0 }
 0x26a   :  { %v1205_v16 = vpop.xlane.xlu1 %1204  ;;  %1379 = vadd.xlane.f32.xlu1 %v1378_v42  ;;  %1382 = vadd.xlane.f32.xlu0 %v1381_v13  ;;  %v1202_v28 = vpop.xlane.xlu0 %1201 }
 0x26b   :  { %v1240_v53 = vmul.f32 0.015625, %v1205_v16  ;;  %v1239_v45 = vmul.f32 0.015625, %v1202_v28  ;;  %v1301_v34 = vmul.f32 %v3171_v15, %v3171_v15  ;;  %v1302_v49 = vmul.f32 %v3168_v35, %v3168_v35  ;;  %v3203_v16 = vld [vmem:[%s3439_s5] ss:$0 sm:$0xff] }
 0x26d   :  { %v3179_v44 = vsub.f32 %v2997_v47, %v1240_v53  ;;  %v3182_v14 = vsub.f32 %v2994_v41, %v1239_v45  ;;  %v1387_v60 = vsel %vm1112_vm1, %v1301_v34, 0.0  ;;  %v1390_v47 = vsel %vm1112_vm1, %v1302_v49, 0.0  ;;  %v3209_v45 = vld [vmem:[%s3440_s6] ss:$0 sm:$0xff] }
 0x26e   :  { %1385 = vadd.xlane.f32.xlu1 %v1384_v10  ;;  %1388 = vadd.xlane.f32.xlu0 %v1387_v60  ;;  %v1208_v31 = vpop.xlane.xlu0 %1207 }
 0x26f   :  { %v1241_v12 = vmul.f32 0.015625, %v1208_v31  ;;  %v1303_v52 = vmul.f32 %v3182_v14, %v3182_v14  ;;  %v1304_v37 = vmul.f32 %v3179_v44, %v3179_v44 }
 0x271   :  { %v3190_v21 = vsub.f32 %v3004_v20, %v1241_v12  ;;  %v1393_v41 = vsel %vm1112_vm1, %v1303_v52, 0.0  ;;  %v1396_v36 = vsel %vm1112_vm1, %v1304_v37, 0.0 }
 0x272   :  { %1391 = vadd.xlane.f32.xlu1 %v1390_v47  ;;  %1394 = vadd.xlane.f32.xlu0 %v1393_v41 }
 0x273   :  { %v1305_v48 = vmul.f32 %v3190_v21, %v3190_v21 }
 0x275   :  { %v1399_v38 = vsel %vm1112_vm1, %v1305_v48, 0.0 }
 0x276   :  { %1397 = vadd.xlane.f32.xlu1 %v1396_v36  ;;  %1400 = vadd.xlane.f32.xlu0 %v1399_v38 }
 0x2bd   :  { %v1311_v20 = vpop.xlane.xlu0 %1310 }
 0x2be   :  { %v1403_v61 = vmul.f32 0.015625, %v1311_v20 }
 0x2c0   :  { %v1435_v22 = vadd.f32 1e-05, %v1403_v61 }
 0x2c2   :  { %2205 = vrsqrt.f32 %v1435_v22 }
 0x2c3   :  { %v1308_v40 = vpop.xlane.xlu1 %1307 }
 0x2c4   :  { %v1402_v43 = vmul.f32 0.015625, %v1308_v40 }
 0x2c6   :  { %v1434_v51 = vadd.f32 1e-05, %v1402_v43 }
 0x2c7   :  { %v1332_v9 = vpop.xlane.xlu1 %1331  ;;  %v1335_v59 = vpop.xlane.xlu0 %1334 }
 0x2c8   :  { %2207 = vrsqrt.f32 %v1434_v51  ;;  %v1410_v33 = vmul.f32 0.015625, %v1332_v9  ;;  %v1411_v24 = vmul.f32 0.015625, %v1335_v59 }
 0x2ca   :  { %v1442_v27 = vadd.f32 1e-05, %v1410_v33  ;;  %v1443_v30 = vadd.f32 1e-05, %v1411_v24 }
 0x2cb   :  { %v1317_v56 = vpop.xlane.xlu0 %1316 }
 0x2cc   :  { %2209 = vrsqrt.f32 %v1442_v27  ;;  %v1405_v42 = vmul.f32 0.015625, %v1317_v56  ;;  %v2206_v13 = vpop.eup %2205 }
 0x2cd   :  { %2211 = vrsqrt.f32 %v1443_v30  ;;  %v1499_v28 = vmul.f32 %v2206_v13, %v3009_v46 }
 0x2ce   :  { %v1437_v53 = vadd.f32 1e-05, %v1405_v42 }
 0x2cf   :  { %v1314_v34 = vpop.xlane.xlu1 %1313  ;;  %v1538_v10 = vmul.f32 %v3203_v16, %v1499_v28 }
 0x2d0   :  { %2213 = vrsqrt.f32 %v1437_v53  ;;  %v1404_v60 = vmul.f32 0.015625, %v1314_v34 }
 0x2d1   :  { %v1577_v31 = vadd.f32 %v3209_v45, %v1538_v10 }
 0x2d2   :  { %v2208_v49 = vpop.eup %2207  ;;  %v1436_v12 = vadd.f32 1e-05, %v1404_v60 }
 0x2d3   :  { %v1498_v52 = vmul.f32 %v2208_v49, %v3018_v29  ;;  %v1338_v47 = vpop.xlane.xlu1 %1337  ;;  %v1341_v41 = vpop.xlane.xlu0 %1340  ;;  %1609 = vst.msk [vmem:[%s3441_s7 + $0x8] sm:$0xff] %vm1112_vm1, %v1577_v31 }
 0x2d4   :  { %2215 = vrsqrt.f32 %v1436_v12  ;;  %v1412_v46 = vmul.f32 0.015625, %v1338_v47  ;;  %v1413_v37 = vmul.f32 0.015625, %v1341_v41 }
 0x2d5   :  { %v1537_v48 = vmul.f32 %v3203_v16, %v1498_v52 }
 0x2d6   :  { %v2210_v36 = vpop.eup %2209  ;;  %v1444_v38 = vadd.f32 1e-05, %v1412_v46  ;;  %v1445_v20 = vadd.f32 1e-05, %v1413_v37 }
 0x2d7   :  { %v2212_v61 = vpop.eup %2211  ;;  %v1576_v22 = vadd.f32 %v3209_v45, %v1537_v48  ;;  %v1506_v29 = vmul.f32 %v2210_v36, %v3014_v3  ;;  %v1320_v40 = vpop.xlane.xlu1 %1319 }
 0x2d8   :  { %v1323_v43 = vpop.xlane.xlu0 %1322  ;;  %v1507_v51 = vmul.f32 %v2212_v61, %v3025_v19  ;;  %2217 = vrsqrt.f32 %v1444_v38  ;;  %v1406_v9 = vmul.f32 0.015625, %v1320_v40 }
 0x2d9   :  { %v1407_v59 = vmul.f32 0.015625, %v1323_v43  ;;  %1608 = vst.msk [vmem:[%s3441_s7] sm:$0xff] %vm1112_vm1, %v1576_v22  ;;  %v1545_v33 = vmul.f32 %v3203_v16, %v1506_v29  ;;  %2219 = vrsqrt.f32 %v1445_v20 }
 0x2da   :  { %v2214_v24 = vpop.eup %2213  ;;  %v1546_v27 = vmul.f32 %v3203_v16, %v1507_v51  ;;  %v1438_v30 = vadd.f32 1e-05, %v1406_v9 }
 0x2db   :  { %v1439_v3 = vadd.f32 1e-05, %v1407_v59  ;;  %v1584_v56 = vadd.f32 %v3209_v45, %v1545_v33  ;;  %v1501_v19 = vmul.f32 %v2214_v24, %v3032_v57  ;;  %v1344_v42 = vpop.xlane.xlu1 %1343 }
 0x2dc   :  { %v1347_v13 = vpop.xlane.xlu0 %1346  ;;  %v1585_v28 = vadd.f32 %v3209_v45, %v1546_v27  ;;  %2221 = vrsqrt.f32 %v1438_v30  ;;  %v1414_v53 = vmul.f32 0.015625, %v1344_v42 }
 0x2dd   :  { %v1415_v34 = vmul.f32 0.015625, %v1347_v13  ;;  %1616 = vst.msk [vmem:[%s3441_s7 + $0x40] sm:$0xff] %vm1112_vm1, %v1584_v56  ;;  %v1540_v10 = vmul.f32 %v3203_v16, %v1501_v19  ;;  %2223 = vrsqrt.f32 %v1439_v3 }
 0x2de   :  { %v2216_v60 = vpop.eup %2215  ;;  %1617 = vst.msk [vmem:[%s3441_s7 + $0x48] sm:$0xff] %vm1112_vm1, %v1585_v28  ;;  %v1446_v57 = vadd.f32 1e-05, %v1414_v53 }
 0x2df   :  { %v1447_v49 = vadd.f32 1e-05, %v1415_v34  ;;  %v1579_v31 = vadd.f32 %v3209_v45, %v1540_v10  ;;  %v1500_v12 = vmul.f32 %v2216_v60, %v3041_v1  ;;  %v1326_v52 = vpop.xlane.xlu1 %1325 }
 0x2e0   :  { %v1329_v47 = vpop.xlane.xlu0 %1328  ;;  %2225 = vrsqrt.f32 %v1446_v57  ;;  %v1408_v41 = vmul.f32 0.015625, %v1326_v52 }
 0x2e1   :  { %v1409_v46 = vmul.f32 0.015625, %v1329_v47  ;;  %1611 = vst.msk [vmem:[%s3441_s7 + $0x18] sm:$0xff] %vm1112_vm1, %v1579_v31  ;;  %v1539_v37 = vmul.f32 %v3203_v16, %v1500_v12  ;;  %2227 = vrsqrt.f32 %v1447_v49 }
 0x2e2   :  { %v2218_v48 = vpop.eup %2217  ;;  %v1440_v36 = vadd.f32 1e-05, %v1408_v41 }
 0x2e3   :  { %v1441_v38 = vadd.f32 1e-05, %v1409_v46  ;;  %v2220_v20 = vpop.eup %2219  ;;  %v1578_v61 = vadd.f32 %v3209_v45, %v1539_v37  ;;  %v1508_v1 = vmul.f32 %v2218_v48, %v3038_v63  ;;  %v1350_v22 = vpop.xlane.xlu1 %1349 }
 0x2e4   :  { %v1353_v29 = vpop.xlane.xlu0 %1352  ;;  %v1509_v40 = vmul.f32 %v2220_v20, %v3052_v8  ;;  %2229 = vrsqrt.f32 %v1440_v36  ;;  %v1416_v43 = vmul.f32 0.015625, %v1350_v22 }
 0x2e5   :  { %v1417_v51 = vmul.f32 0.015625, %v1353_v29  ;;  %1610 = vst.msk [vmem:[%s3441_s7 + $0x10] sm:$0xff] %vm1112_vm1, %v1578_v61  ;;  %v1547_v9 = vmul.f32 %v3203_v16, %v1508_v1  ;;  %2231 = vrsqrt.f32 %v1441_v38 }
 0x2e6   :  { %v2222_v59 = vpop.eup %2221  ;;  %v1548_v33 = vmul.f32 %v3203_v16, %v1509_v40  ;;  %v1448_v24 = vadd.f32 1e-05, %v1416_v43 }
 0x2e7   :  { %v1449_v63 = vadd.f32 1e-05, %v1417_v51  ;;  %v2224_v27 = vpop.eup %2223  ;;  %v1586_v30 = vadd.f32 %v3209_v45, %v1547_v9  ;;  %v1502_v8 = vmul.f32 %v2222_v59, %v3049_v4  ;;  %v1356_v3 = vpop.xlane.xlu1 %1355 }
 0x2e8   :  { %v1359_v56 = vpop.xlane.xlu0 %1358  ;;  %v1587_v19 = vadd.f32 %v3209_v45, %v1548_v33  ;;  %v1503_v42 = vmul.f32 %v2224_v27, %v3062_v11  ;;  %2233 = vrsqrt.f32 %v1448_v24  ;;  %v1418_v13 = vmul.f32 0.015625, %v1356_v3 }
 0x2e9   :  { %1618 = vst.msk [vmem:[%s3441_s7 + $0x50] sm:$0xff] %vm1112_vm1, %v1586_v30  ;;  %v1541_v28 = vmul.f32 %v3203_v16, %v1502_v8  ;;  %2235 = vrsqrt.f32 %v1449_v63  ;;  %v1419_v53 = vmul.f32 0.015625, %v1359_v56 }
 0x2ea   :  { %v2226_v34 = vpop.eup %2225  ;;  %1619 = vst.msk [vmem:[%s3441_s7 + $0x58] sm:$0xff] %vm1112_vm1, %v1587_v19  ;;  %v1542_v4 = vmul.f32 %v3203_v16, %v1503_v42  ;;  %v1450_v11 = vadd.f32 1e-05, %v1418_v13 }
 0x2eb   :  { %v2228_v10 = vpop.eup %2227  ;;  %v1580_v60 = vadd.f32 %v3209_v45, %v1541_v28  ;;  %v1510_v57 = vmul.f32 %v2226_v34, %v3059_v5  ;;  %v1451_v49 = vadd.f32 1e-05, %v1419_v53  ;;  %v1362_v31 = vpop.xlane.xlu1 %1361 }
 0x2ec   :  { %v1365_v12 = vpop.xlane.xlu0 %1364  ;;  %v1581_v52 = vadd.f32 %v3209_v45, %v1542_v4  ;;  %v1511_v47 = vmul.f32 %v2228_v10, %v3075_v17  ;;  %2237 = vrsqrt.f32 %v1450_v11  ;;  %v1420_v41 = vmul.f32 0.015625, %v1362_v31 }
 0x2ed   :  { %1612 = vst.msk [vmem:[%s3441_s7 + $0x20] sm:$0xff] %vm1112_vm1, %v1580_v60  ;;  %v1549_v46 = vmul.f32 %v3203_v16, %v1510_v57  ;;  %2239 = vrsqrt.f32 %v1451_v49  ;;  %v1421_v37 = vmul.f32 0.015625, %v1365_v12 }
 0x2ee   :  { %v2230_v48 = vpop.eup %2229  ;;  %1613 = vst.msk [vmem:[%s3441_s7 + $0x28] sm:$0xff] %vm1112_vm1, %v1581_v52  ;;  %v1550_v5 = vmul.f32 %v3203_v16, %v1511_v47  ;;  %v1452_v17 = vadd.f32 1e-05, %v1420_v41 }
 0x2ef   :  { %v2232_v36 = vpop.eup %2231  ;;  %v1588_v38 = vadd.f32 %v3209_v45, %v1549_v46  ;;  %v1504_v20 = vmul.f32 %v2230_v48, %v3072_v50  ;;  %v1453_v61 = vadd.f32 1e-05, %v1421_v37  ;;  %v1368_v1 = vpop.xlane.xlu1 %1367 }
 0x2f0   :  { %v1371_v22 = vpop.xlane.xlu0 %1370  ;;  %v1589_v29 = vadd.f32 %v3209_v45, %v1550_v5  ;;  %v1505_v40 = vmul.f32 %v2232_v36, %v3086_v54  ;;  %2241 = vrsqrt.f32 %v1452_v17  ;;  %v1422_v43 = vmul.f32 0.015625, %v1368_v1 }
 0x2f1   :  { %1620 = vst.msk [vmem:[%s3441_s7 + $0x60] sm:$0xff] %vm1112_vm1, %v1588_v38  ;;  %v1543_v51 = vmul.f32 %v3203_v16, %v1504_v20  ;;  %2243 = vrsqrt.f32 %v1453_v61  ;;  %v1423_v9 = vmul.f32 0.015625, %v1371_v22 }
 0x2f2   :  { %v2234_v59 = vpop.eup %2233  ;;  %1621 = vst.msk [vmem:[%s3441_s7 + $0x68] sm:$0xff] %vm1112_vm1, %v1589_v29  ;;  %v1544_v50 = vmul.f32 %v3203_v16, %v1505_v40  ;;  %v1454_v54 = vadd.f32 1e-05, %v1422_v43 }
 0x2f3   :  { %v2236_v33 = vpop.eup %2235  ;;  %v1582_v24 = vadd.f32 %v3209_v45, %v1543_v51  ;;  %v1512_v63 = vmul.f32 %v2234_v59, %v3083_v0  ;;  %v1455_v27 = vadd.f32 1e-05, %v1423_v9  ;;  %v1374_v30 = vpop.xlane.xlu1 %1373 }
 0x2f4   :  { %v1377_v8 = vpop.xlane.xlu0 %1376  ;;  %v1583_v3 = vadd.f32 %v3209_v45, %v1544_v50  ;;  %v1513_v56 = vmul.f32 %v2236_v33, %v3099_v62  ;;  %2245 = vrsqrt.f32 %v1454_v54  ;;  %v1424_v19 = vmul.f32 0.015625, %v1374_v30 }
 0x2f5   :  { %1614 = vst.msk [vmem:[%s3441_s7 + $0x30] sm:$0xff] %vm1112_vm1, %v1582_v24  ;;  %v1551_v42 = vmul.f32 %v3203_v16, %v1512_v63  ;;  %2247 = vrsqrt.f32 %v1455_v27  ;;  %v1425_v13 = vmul.f32 0.015625, %v1377_v8 }
 0x2f6   :  { %v2238_v28 = vpop.eup %2237  ;;  %1615 = vst.msk [vmem:[%s3441_s7 + $0x38] sm:$0xff] %vm1112_vm1, %v1583_v3  ;;  %v1552_v0 = vmul.f32 %v3203_v16, %v1513_v56  ;;  %v1456_v62 = vadd.f32 1e-05, %v1424_v19 }
 0x2f7   :  { %v2240_v53 = vpop.eup %2239  ;;  %v1590_v34 = vadd.f32 %v3209_v45, %v1551_v42  ;;  %v1514_v4 = vmul.f32 %v2238_v28, %v3096_v18  ;;  %v1457_v11 = vadd.f32 1e-05, %v1425_v13  ;;  %v1380_v10 = vpop.xlane.xlu1 %1379 }
 0x2f8   :  { %v1383_v60 = vpop.xlane.xlu0 %1382  ;;  %v1591_v57 = vadd.f32 %v3209_v45, %v1552_v0  ;;  %v1515_v49 = vmul.f32 %v2240_v53, %v3110_v55  ;;  %2249 = vrsqrt.f32 %v1456_v62  ;;  %v1426_v31 = vmul.f32 0.015625, %v1380_v10 }
 0x2f9   :  { %1622 = vst.msk [vmem:[%s3441_s7 + $0x70] sm:$0xff] %vm1112_vm1, %v1590_v34  ;;  %v1553_v12 = vmul.f32 %v3203_v16, %v1514_v4  ;;  %2251 = vrsqrt.f32 %v1457_v11  ;;  %v1427_v52 = vmul.f32 0.015625, %v1383_v60 }
 0x2fa   :  { %v2242_v47 = vpop.eup %2241  ;;  %1623 = vst.msk [vmem:[%s3441_s7 + $0x78] sm:$0xff] %vm1112_vm1, %v1591_v57  ;;  %v1554_v18 = vmul.f32 %v3203_v16, %v1515_v49  ;;  %v1458_v55 = vadd.f32 1e-05, %v1426_v31 }
 0x2fb   :  { %v2244_v41 = vpop.eup %2243  ;;  %v1592_v46 = vadd.f32 %v3209_v45, %v1553_v12  ;;  %v1516_v37 = vmul.f32 %v2242_v47, %v3107_v7  ;;  %v1459_v48 = vadd.f32 1e-05, %v1427_v52  ;;  %v1386_v5 = vpop.xlane.xlu1 %1385 }
 0x2fc   :  { %v1389_v17 = vpop.xlane.xlu0 %1388  ;;  %v1593_v36 = vadd.f32 %v3209_v45, %v1554_v18  ;;  %v1517_v38 = vmul.f32 %v2244_v41, %v3123_v6  ;;  %2253 = vrsqrt.f32 %v1458_v55  ;;  %v1428_v20 = vmul.f32 0.015625, %v1386_v5 }
 0x2fd   :  { %1624 = vst.msk [vmem:[%s3441_s7 + $0x80] sm:$0xff] %vm1112_vm1, %v1592_v46  ;;  %v1555_v61 = vmul.f32 %v3203_v16, %v1516_v37  ;;  %2255 = vrsqrt.f32 %v1459_v48  ;;  %v1429_v1 = vmul.f32 0.015625, %v1389_v17 }
 0x2fe   :  { %v2246_v22 = vpop.eup %2245  ;;  %1625 = vst.msk [vmem:[%s3441_s7 + $0x88] sm:$0xff] %vm1112_vm1, %v1593_v36  ;;  %v1556_v7 = vmul.f32 %v3203_v16, %v1517_v38  ;;  %v1460_v6 = vadd.f32 1e-05, %v1428_v20 }
 0x2ff   :  { %v2248_v29 = vpop.eup %2247  ;;  %v1594_v40 = vadd.f32 %v3209_v45, %v1555_v61  ;;  %v1518_v43 = vmul.f32 %v2246_v22, %v3120_v23  ;;  %v1461_v51 = vadd.f32 1e-05, %v1429_v1  ;;  %v1392_v9 = vpop.xlane.xlu1 %1391 }
 0x300   :  { %v1395_v59 = vpop.xlane.xlu0 %1394  ;;  %v1595_v50 = vadd.f32 %v3209_v45, %v1556_v7  ;;  %v1519_v54 = vmul.f32 %v2248_v29, %v3134_v2  ;;  %2257 = vrsqrt.f32 %v1460_v6  ;;  %v1430_v33 = vmul.f32 0.015625, %v1392_v9 }
 0x301   :  { %1626 = vst.msk [vmem:[%s3441_s7 + $0x90] sm:$0xff] %vm1112_vm1, %v1594_v40  ;;  %v1557_v24 = vmul.f32 %v3203_v16, %v1518_v43  ;;  %2259 = vrsqrt.f32 %v1461_v51  ;;  %v1431_v63 = vmul.f32 0.015625, %v1395_v59 }
 0x302   :  { %v2250_v27 = vpop.eup %2249  ;;  %1627 = vst.msk [vmem:[%s3441_s7 + $0x98] sm:$0xff] %vm1112_vm1, %v1595_v50  ;;  %v1558_v23 = vmul.f32 %v3203_v16, %v1519_v54  ;;  %v1462_v2 = vadd.f32 1e-05, %v1430_v33 }
 0x303   :  { %v2252_v30 = vpop.eup %2251  ;;  %v1596_v8 = vadd.f32 %v3209_v45, %v1557_v24  ;;  %v1520_v3 = vmul.f32 %v2250_v27, %v3131_v39  ;;  %v1463_v56 = vadd.f32 1e-05, %v1431_v63  ;;  %v1398_v19 = vpop.xlane.xlu1 %1397 }
 0x304   :  { %v1401_v42 = vpop.xlane.xlu0 %1400  ;;  %v1597_v13 = vadd.f32 %v3209_v45, %v1558_v23  ;;  %v1521_v28 = vmul.f32 %v2252_v30, %v3147_v58  ;;  %2261 = vrsqrt.f32 %v1462_v2  ;;  %v1432_v0 = vmul.f32 0.015625, %v1398_v19 }
 0x305   :  { %1628 = vst.msk [vmem:[%s3441_s7 + $0xa0] sm:$0xff] %vm1112_vm1, %v1596_v8  ;;  %v1559_v62 = vmul.f32 %v3203_v16, %v1520_v3  ;;  %2263 = vrsqrt.f32 %v1463_v56  ;;  %v1433_v53 = vmul.f32 0.015625, %v1401_v42 }
 0x306   :  { %v2254_v34 = vpop.eup %2253  ;;  %1629 = vst.msk [vmem:[%s3441_s7 + $0xa8] sm:$0xff] %vm1112_vm1, %v1597_v13  ;;  %v1560_v39 = vmul.f32 %v3203_v16, %v1521_v28  ;;  %v1464_v58 = vadd.f32 1e-05, %v1432_v0 }
 0x307   :  { %v2256_v4 = vpop.eup %2255  ;;  %v1598_v11 = vadd.f32 %v3209_v45, %v1559_v62  ;;  %v1522_v10 = vmul.f32 %v2254_v34, %v3144_v26  ;;  %v1465_v60 = vadd.f32 1e-05, %v1433_v53 }
 0x308   :  { %v1599_v57 = vadd.f32 %v3209_v45, %v1560_v39  ;;  %v1523_v49 = vmul.f32 %v2256_v4, %v3158_v25  ;;  %2265 = vrsqrt.f32 %v1464_v58 }
 0x309   :  { %1630 = vst.msk [vmem:[%s3441_s7 + $0xb0] sm:$0xff] %vm1112_vm1, %v1598_v11  ;;  %v1561_v31 = vmul.f32 %v3203_v16, %v1522_v10  ;;  %2267 = vrsqrt.f32 %v1465_v60 }
 0x30a   :  { %v2258_v12 = vpop.eup %2257  ;;  %1631 = vst.msk [vmem:[%s3441_s7 + $0xb8] sm:$0xff] %vm1112_vm1, %v1599_v57  ;;  %v1562_v26 = vmul.f32 %v3203_v16, %v1523_v49 }
 0x30b   :  { %v2260_v52 = vpop.eup %2259  ;;  %v1600_v25 = vadd.f32 %v3209_v45, %v1561_v31  ;;  %v1524_v47 = vmul.f32 %v2258_v12, %v3155_v32 }
 0x30c   :  { %v1601_v18 = vadd.f32 %v3209_v45, %v1562_v26  ;;  %v1525_v55 = vmul.f32 %v2260_v52, %v3171_v15 }
 0x30d   :  { %1632 = vst.msk [vmem:[%s3441_s7 + $0xc0] sm:$0xff] %vm1112_vm1, %v1600_v25  ;;  %v1563_v41 = vmul.f32 %v3203_v16, %v1524_v47 }
 0x30e   :  { %v2262_v46 = vpop.eup %2261  ;;  %1633 = vst.msk [vmem:[%s3441_s7 + $0xc8] sm:$0xff] %vm1112_vm1, %v1601_v18  ;;  %v1564_v37 = vmul.f32 %v3203_v16, %v1525_v55 }
 0x30f   :  { %v2264_v32 = vpop.eup %2263  ;;  %v1602_v48 = vadd.f32 %v3209_v45, %v1563_v41  ;;  %v1526_v15 = vmul.f32 %v2262_v46, %v3168_v35 }
 0x310   :  { %v1603_v5 = vadd.f32 %v3209_v45, %v1564_v37  ;;  %v1527_v17 = vmul.f32 %v2264_v32, %v3182_v14 }
 0x311   :  { %1634 = vst.msk [vmem:[%s3441_s7 + $0xd0] sm:$0xff] %vm1112_vm1, %v1602_v48  ;;  %v1565_v36 = vmul.f32 %v3203_v16, %v1526_v15 }
 0x312   :  { %v2266_v38 = vpop.eup %2265  ;;  %1635 = vst.msk [vmem:[%s3441_s7 + $0xd8] sm:$0xff] %vm1112_vm1, %v1603_v5  ;;  %v1566_v20 = vmul.f32 %v3203_v16, %v1527_v17 }
 0x313   :  { %v2268_v35 = vpop.eup %2267  ;;  %v1604_v61 = vadd.f32 %v3209_v45, %v1565_v36  ;;  %v1528_v14 = vmul.f32 %v2266_v38, %v3179_v44 }
 0x314   :  { %v1605_v1 = vadd.f32 %v3209_v45, %v1566_v20  ;;  %v1529_v22 = vmul.f32 %v2268_v35, %v3190_v21 }
 0x315   :  { %1636 = vst.msk [vmem:[%s3441_s7 + $0xe0] sm:$0xff] %vm1112_vm1, %v1604_v61  ;;  %v1567_v7 = vmul.f32 %v3203_v16, %v1528_v14 }
 0x316   :  { %1637 = vst.msk [vmem:[%s3441_s7 + $0xe8] sm:$0xff] %vm1112_vm1, %v1605_v1  ;;  %v1568_v6 = vmul.f32 %v3203_v16, %v1529_v22 }
 0x317   :  { %v1606_v44 = vadd.f32 %v3209_v45, %v1567_v7 }
 0x318   :  { %v1607_v29 = vadd.f32 %v3209_v45, %v1568_v6 }
 0x319   :  { %1638 = vst.msk [vmem:[%s3441_s7 + $0xf0] sm:$0xff] %vm1112_vm1, %v1606_v44 }
 0x31a   :  { %1639 = vst.msk [vmem:[%s3441_s7 + $0xf8] sm:$0xff] %vm1112_vm1, %v1607_v29 }

</bundles_post_ra>
